<compile_context>
chip_gen: v7x
topology: tpu7x:2x2x1
jax: 0.10.0
libtpu: 0.0.40
codegen_flags: <defaults>
</compile_context>

<pallas_src>
import math

import jax
import jax.numpy as jnp
from jax.experimental import pallas as pl
from jax.experimental.pallas import tpu as pltpu


NUM_CLASSES = 10
INP_SIZE = 28 * 28  # 784, hard-coded by MNISTNet.forward()
LANE = 128


def _round_up(v, m):
    return ((v + m - 1) // m) * m


def _mnist_nll_kernel(x_ref, mat0_ref, b0_ref, fmat_ref, fb_ref, tgt_ref, nll_ref):
    """One batch tile of MNISTNet forward + per-sample NLL.

    x_ref    : (TB, 784) f32    batch tile (streamed / double-buffered)
    mat0_ref : (784, HP) bf16   hidden weights, zero-padded to HP=128 lanes (resident)
    b0_ref   : (1, HP)   f32    hidden bias, zero-padded (resident)
    fmat_ref : (HP, 10)  f32    output weights, zero-padded rows (resident)
    fb_ref   : (1, 10)   f32    output bias (resident)
    tgt_ref  : (TB, 1)   i32    target class ids (streamed)
    nll_ref  : (TB, 1)   f32    per-sample -log p[target]  (output tile)
    """
    # Cast the streamed f32 tile to bf16 inside the kernel (VMEM-local) so HBM only
    # ever carries the original f32 x once.
    x_bf16 = x_ref[...].astype(jnp.bfloat16)

    # Hidden layer: MXU bf16 matmul with f32 accumulation, then f32 sigmoid.
    z0 = jnp.dot(x_bf16, mat0_ref[...],
                 preferred_element_type=jnp.float32) + b0_ref[...]
    # sigmoid(z) = 1 / (1 + exp(-z)); exp -> EUP, approx reciprocal -> EUP vrcp.
    h = pl.reciprocal(1.0 + jnp.exp(-z0), approx=True)

    # Output layer: logits = h @ final_mat + final_bias.  Padded rows of final_mat
    # are zero, so the padded hidden columns contribute exactly nothing.
    logits = jnp.dot(h, fmat_ref[...],
                     preferred_element_type=jnp.float32) + fb_ref[...]

    # Numerically stable log_softmax along the class dim (all per-row ops).
    m = jnp.max(logits, axis=1, keepdims=True)
    shifted = logits - m
    lse = jnp.log(jnp.sum(jnp.exp(shifted), axis=1, keepdims=True))
    logp = shifted - lse  # (TB, C) f32

    # Per-sample NLL: pick -logp at the target class via a one-hot mask (no gathers).
    tb, c = logp.shape
    class_ids = jax.lax.broadcasted_iota(jnp.int32, (tb, c), 1)
    onehot = (class_ids == tgt_ref[...]).astype(jnp.float32)  # (TB,1) broadcasts over C
    nll_ref[...] = -jnp.sum(onehot * logp, axis=1, keepdims=True)


def mnist_net_loss(x, targets, params, *, block_b=512):
    """MNISTNet forward + mean NLL loss via a batch-tiled Pallas call.

    x       : (B, 784) float32
    targets : (B,)     int class indices in [0, NUM_CLASSES)
    params  : dict with 'mat_0', 'bias_0', 'final_mat', 'final_bias'
    block_b : batch rows per grid step (rounded to a multiple of 8).
    """
    # TODO(synk): only the default MNISTNet config (n_layers=1) is lowered here;
    # deeper configs would chain extra resident zero-padded (HP, HP) hidden layers.
    B = x.shape[0]
    mat0 = params["mat_0"]                        # (784, H)
    b0 = params["bias_0"].reshape(1, -1)          # (1, H)
    fmat = params["final_mat"]                    # (H, C)
    fb = params["final_bias"].reshape(1, -1)      # (1, C)
    H = mat0.shape[1]
    C = fmat.shape[1]

    # Zero-pad the tiny hidden dim (5) to a full 128-lane width (identical math,
    # lane-dense layout for h and mat_0).  These are tiny, VMEM-resident arrays.
    HP = _round_up(max(H, LANE), LANE)
    mat0_p = (jnp.zeros((INP_SIZE, HP), jnp.float32)
              .at[:, :H].set(mat0.astype(jnp.float32)).astype(jnp.bfloat16))
    b0_p = jnp.zeros((1, HP), jnp.float32).at[:, :H].set(b0.astype(jnp.float32))
    fmat_p = jnp.zeros((HP, C), jnp.float32).at[:H, :].set(fmat.astype(jnp.float32))
    fb_p = fb.astype(jnp.float32)

    # Batch tiling: no wrapper-side padding / casting of x.  The grid over-runs the
    # batch; Pallas masks the partial last tile's writes and every kernel op is
    # row-local, so all B rows of the output are exact.
    tb = min(_round_up(int(block_b), 8), _round_up(B, 8))
    num_tiles = pl.cdiv(B, tb)

    x = x.astype(jnp.float32)
    tgt2d = targets.reshape(B, 1).astype(jnp.int32)

    grid_spec = pltpu.PrefetchScalarGridSpec(
        num_scalar_prefetch=0,
        grid=(num_tiles,),
        in_specs=[
            pl.BlockSpec((tb, INP_SIZE), lambda i: (i, 0)),   # x tile     (streamed)
            pl.BlockSpec((INP_SIZE, HP), lambda i: (0, 0)),   # mat_0      (resident)
            pl.BlockSpec((1, HP),        lambda i: (0, 0)),   # bias_0     (resident)
            pl.BlockSpec((HP, C),        lambda i: (0, 0)),   # final_mat  (resident)
            pl.BlockSpec((1, C),         lambda i: (0, 0)),   # final_bias (resident)
            pl.BlockSpec((tb, 1),        lambda i: (i, 0)),   # targets tile
        ],
        out_specs=pl.BlockSpec((tb, 1), lambda i: (i, 0)),    # per-sample NLL tile
    )

    per_sample = pl.pallas_call(
        _mnist_nll_kernel,
        out_shape=jax.ShapeDtypeStruct((B, 1), jnp.float32),
        grid_spec=grid_spec,
        compiler_params=pltpu.CompilerParams(
            dimension_semantics=("parallel",),   # independent tiles -> megacore-shardable
            vmem_limit_bytes=32 * 1024 * 1024,   # safe on v5e/v6e/v7x for tb <= 2048
        ),
    )(x, mat0_p, b0_p, fmat_p, fb_p, tgt2d)

    # nn.NLLLoss default 'mean' reduction over the batch.
    return jnp.mean(per_sample)


def init_params(key, layer_size=5, n_layers=1):
    """Deterministic xavier_normal_ weights / zero biases, matching MNISTNet.__init__."""
    params = {}
    inp_size = INP_SIZE
    keys = jax.random.split(key, n_layers + 1)
    for i in range(n_layers):
        std = math.sqrt(2.0 / (inp_size + layer_size))
        params[f"mat_{i}"] = std * jax.random.normal(
            keys[i], (inp_size, layer_size), dtype=jnp.float32)
        params[f"bias_{i}"] = jnp.zeros((layer_size,), dtype=jnp.float32)
        inp_size = layer_size
    std = math.sqrt(2.0 / (inp_size + NUM_CLASSES))
    params["final_mat"] = std * jax.random.normal(
        keys[-1], (inp_size, NUM_CLASSES), dtype=jnp.float32)
    params["final_bias"] = jnp.zeros((NUM_CLASSES,), dtype=jnp.float32)
    return params


if __name__ == "__main__":
    key = jax.random.PRNGKey(0)
    k_param, k_x, k_t = jax.random.split(key, 3)

    # Small shapes; feature dim is fixed at 28*28 = 784 by the module's forward().
    # B=200 with a 128-row tile exercises a full tile AND the masked tail tile.
    B = 200
    params = init_params(k_param, layer_size=5, n_layers=1)
    x = jax.random.normal(k_x, (B, INP_SIZE), dtype=jnp.float32)
    targets = jax.random.randint(k_t, (B,), 0, NUM_CLASSES, dtype=jnp.int32)

    loss = mnist_net_loss(x, targets, params, block_b=128)
    jax.block_until_ready(loss)

    # Pure-JAX reference: same bf16 MXU inputs with f32 accumulation, exact sigmoid.
    # Tolerance covers the approx-reciprocal sigmoid used in the kernel.
    xb = x.astype(jnp.bfloat16)
    m0b = params["mat_0"].astype(jnp.bfloat16)
    z0 = jnp.dot(xb, m0b, preferred_element_type=jnp.float32) + params["bias_0"]
    h = jax.nn.sigmoid(z0)
    logits = h @ params["final_mat"] + params["final_bias"]
    logp = jax.nn.log_softmax(logits, axis=1)
    ref = -jnp.mean(logp[jnp.arange(B), targets])

    assert bool(jnp.isfinite(loss)), loss
    assert jnp.allclose(loss, ref, atol=2e-2, rtol=2e-2), (loss, ref)

    print("KERNEL_OK")
</pallas_src>

<mosaic_0001>
module attributes {stable_mosaic.version = 11 : i64} {
  func.func @_mnist_nll_kernel(%arg0: i32, %arg1: memref<128x784xf32, #tpu.memory_space<vmem>>, %arg2: memref<784x128xbf16, #tpu.memory_space<vmem>>, %arg3: memref<1x128xf32, #tpu.memory_space<vmem>>, %arg4: memref<128x10xf32, #tpu.memory_space<vmem>>, %arg5: memref<1x10xf32, #tpu.memory_space<vmem>>, %arg6: memref<128x1xi32, #tpu.memory_space<vmem>>, %arg7: memref<128x1xf32, #tpu.memory_space<vmem>>) attributes {dimension_semantics = [#tpu.dimension_semantics<parallel>], iteration_bounds = array<i64: 2>, scalar_prefetch = 0 : i64, scratch_operands = 0 : i64, tpu.core_type = #tpu.core_type<tc>, window_params = [{transform_indices = @transform_0, window_bounds = array<i64: 128, 784>}, {pipeline_mode = #tpu.pipeline_mode<synchronous>, transform_indices = @transform_1, window_bounds = array<i64: 784, 128>}, {pipeline_mode = #tpu.pipeline_mode<synchronous>, transform_indices = @transform_2, window_bounds = array<i64: 1, 128>}, {pipeline_mode = #tpu.pipeline_mode<synchronous>, transform_indices = @transform_3, window_bounds = array<i64: 128, 10>}, {pipeline_mode = #tpu.pipeline_mode<synchronous>, transform_indices = @transform_4, window_bounds = array<i64: 1, 10>}, {transform_indices = @transform_5, window_bounds = array<i64: 128, 1>}, {transform_indices = @transform_6, window_bounds = array<i64: 128, 1>}]} {
    %c0 = arith.constant 0 : index
    %c0_0 = arith.constant 0 : index
    %0 = vector.load %arg1[%c0, %c0_0] : memref<128x784xf32, #tpu.memory_space<vmem>>, vector<128x784xf32>
    %1 = arith.truncf %0 : vector<128x784xf32> to vector<128x784xbf16>
    %c0_1 = arith.constant 0 : index
    %c0_2 = arith.constant 0 : index
    %2 = vector.load %arg2[%c0_1, %c0_2] : memref<784x128xbf16, #tpu.memory_space<vmem>>, vector<784x128xbf16>
    %cst = arith.constant dense<0.000000e+00> : vector<128x128xf32>
    %3 = tpu.matmul %1, %2, %cst {dimension_numbers = #tpu.dot_dimension_numbers<[1], [0], [0], [1], [0, 0, 1, 1], [], []>} : vector<128x784xbf16>, vector<784x128xbf16>, vector<128x128xf32> -> vector<128x128xf32>
    %c0_3 = arith.constant 0 : index
    %c0_4 = arith.constant 0 : index
    %4 = vector.load %arg3[%c0_3, %c0_4] : memref<1x128xf32, #tpu.memory_space<vmem>>, vector<1x128xf32>
    %5 = vector.broadcast %4 : vector<1x128xf32> to vector<128x128xf32>
    %6 = arith.addf %3, %5 : vector<128x128xf32>
    %cst_5 = arith.constant 0.000000e+00 : f32
    %7 = vector.broadcast %cst_5 : f32 to vector<128x128xf32>
    %8 = arith.subf %7, %6 : vector<128x128xf32>
    %9 = math.exp %8 : vector<128x128xf32>
    %cst_6 = arith.constant 1.000000e+00 : f32
    %10 = vector.broadcast %cst_6 : f32 to vector<128x128xf32>
    %11 = arith.addf %10, %9 : vector<128x128xf32>
    %12 = tpu.reciprocal %11 {approx = true} : vector<128x128xf32> -> vector<128x128xf32>
    %c0_7 = arith.constant 0 : index
    %c0_8 = arith.constant 0 : index
    %13 = vector.load %arg4[%c0_7, %c0_8] : memref<128x10xf32, #tpu.memory_space<vmem>>, vector<128x10xf32>
    %cst_9 = arith.constant dense<0.000000e+00> : vector<128x10xf32>
    %14 = tpu.matmul %12, %13, %cst_9 {dimension_numbers = #tpu.dot_dimension_numbers<[1], [0], [0], [1], [0, 0, 1, 1], [], []>} : vector<128x128xf32>, vector<128x10xf32>, vector<128x10xf32> -> vector<128x10xf32>
    %c0_10 = arith.constant 0 : index
    %c0_11 = arith.constant 0 : index
    %15 = vector.load %arg5[%c0_10, %c0_11] : memref<1x10xf32, #tpu.memory_space<vmem>>, vector<1x10xf32>
    %16 = vector.broadcast %15 : vector<1x10xf32> to vector<128x10xf32>
    %17 = arith.addf %14, %16 : vector<128x10xf32>
    %cst_12 = arith.constant dense<0xFF800000> : vector<128xf32>
    %18 = vector.multi_reduction <maximumf>, %17, %cst_12 [1] : vector<128x10xf32> to vector<128xf32>
    %19 = vector.shape_cast %18 : vector<128xf32> to vector<128x1xf32>
    %20 = vector.broadcast %19 : vector<128x1xf32> to vector<128x10xf32>
    %21 = arith.subf %17, %20 : vector<128x10xf32>
    %22 = math.exp %21 : vector<128x10xf32>
    %cst_13 = arith.constant dense<0.000000e+00> : vector<128xf32>
    %23 = vector.multi_reduction <add>, %22, %cst_13 [1] : vector<128x10xf32> to vector<128xf32>
    %24 = vector.shape_cast %23 : vector<128xf32> to vector<128x1xf32>
    %25 = math.log %24 : vector<128x1xf32>
    %26 = vector.broadcast %25 : vector<128x1xf32> to vector<128x10xf32>
    %27 = arith.subf %21, %26 : vector<128x10xf32>
    %28 = tpu.iota {dimensions = array<i32: 1>} : vector<128x10xi32>
    %c0_14 = arith.constant 0 : index
    %c0_15 = arith.constant 0 : index
    %29 = vector.load %arg6[%c0_14, %c0_15] : memref<128x1xi32, #tpu.memory_space<vmem>>, vector<128x1xi32>
    %30 = vector.broadcast %29 : vector<128x1xi32> to vector<128x10xi32>
    %31 = arith.cmpi eq, %28, %30 : vector<128x10xi32>
    %32 = arith.extui %31 : vector<128x10xi1> to vector<128x10xi32>
    %33 = arith.sitofp %32 : vector<128x10xi32> to vector<128x10xf32>
    %34 = arith.mulf %33, %27 : vector<128x10xf32>
    %cst_16 = arith.constant dense<0.000000e+00> : vector<128xf32>
    %35 = vector.multi_reduction <add>, %34, %cst_16 [1] : vector<128x10xf32> to vector<128xf32>
    %36 = vector.shape_cast %35 : vector<128xf32> to vector<128x1xf32>
    %cst_17 = arith.constant 0.000000e+00 : f32
    %37 = vector.broadcast %cst_17 : f32 to vector<128x1xf32>
    %38 = arith.subf %37, %36 : vector<128x1xf32>
    %c0_18 = arith.constant 0 : index
    %c0_19 = arith.constant 0 : index
    %39 = vector.load %arg7[%c0_18, %c0_19] : memref<128x1xf32, #tpu.memory_space<vmem>>, vector<128x1xf32>
    tpu.vector_store %arg7[%c0_18, %c0_19], %38 {strides = array<i32>} : memref<128x1xf32, #tpu.memory_space<vmem>>, vector<128x1xf32>,
    return
  }
  func.func @transform_0(%arg0: i32) -> (i32, i32) {
    %c0_i32 = arith.constant 0 : i32
    %c0_i32_0 = arith.constant 0 : i32
    return %arg0, %c0_i32 : i32, i32
  }
  func.func @transform_1(%arg0: i32) -> (i32, i32) {
    %c0_i32 = arith.constant 0 : i32
    %c0_i32_0 = arith.constant 0 : i32
    %c0_i32_1 = arith.constant 0 : i32
    return %c0_i32, %c0_i32_0 : i32, i32
  }
  func.func @transform_2(%arg0: i32) -> (i32, i32) {
    %c0_i32 = arith.constant 0 : i32
    %c0_i32_0 = arith.constant 0 : i32
    %c0_i32_1 = arith.constant 0 : i32
    return %c0_i32, %c0_i32_0 : i32, i32
  }
  func.func @transform_3(%arg0: i32) -> (i32, i32) {
    %c0_i32 = arith.constant 0 : i32
    %c0_i32_0 = arith.constant 0 : i32
    %c0_i32_1 = arith.constant 0 : i32
    return %c0_i32, %c0_i32_0 : i32, i32
  }
  func.func @transform_4(%arg0: i32) -> (i32, i32) {
    %c0_i32 = arith.constant 0 : i32
    %c0_i32_0 = arith.constant 0 : i32
    %c0_i32_1 = arith.constant 0 : i32
    return %c0_i32, %c0_i32_0 : i32, i32
  }
  func.func @transform_5(%arg0: i32) -> (i32, i32) {
    %c0_i32 = arith.constant 0 : i32
    %c0_i32_0 = arith.constant 0 : i32
    return %arg0, %c0_i32 : i32, i32
  }
  func.func @transform_6(%arg0: i32) -> (i32, i32) {
    %c0_i32 = arith.constant 0 : i32
    %c0_i32_0 = arith.constant 0 : i32
    return %arg0, %c0_i32 : i32, i32
  }
}

</mosaic_0001>

<bundles_post_ra>
// kernel: tpu_custom_call.1
= control target key start
LH: loop header
LB: loop body
LE: loop exit
PB: predicated region body
PF: predicated region fallthrough
CT: control target
= control target key end

     0   :  { %11 = vsyncpa [#allocation3], 0  ;;  %s4048_s0 = inlined_call_operand.hbm [shape: f32[200,784], index: 0, kind: input, shape index: {}]   ;;  %s4049_s1 = inlined_call_operand.hbm [shape: bf16[784,128], index: 1, kind: input, shape index: {}]   ;;  %s4050_s2 = inlined_call_operand.vmem [shape: f32[1,128], index: 2, kind: input, shape index: {}]   ;;  %s4051_s3 = inlined_call_operand.vmem [shape: f32[128,10], index: 3, kind: input, shape index: {}]   ;;  %s4052_s4 = inlined_call_operand.vmem [shape: f32[1,10], index: 4, kind: input, shape index: {}]   ;;  %s4053_s5 = inlined_call_operand.vmem [shape: s32[200,1], index: 5, kind: input, shape index: {}]   ;;  %s4054_s6 = inlined_call_operand.vmem [shape: f32[200,1], index: 6, kind: output, shape index: {}]  }
   0x1   :  { %13 = vsyncpa [#allocation3 + $0x1], 0 }
   0x2   :  { %14 = vsyncpa [#allocation5], 0  ;;  %s3232_s21 = smov 0   ;;  %s3234_s22 = smov 0  }
   0x3   :  { %s3236_s23 = smov 0   ;;  %s3238_s24 = smov 0  }
   0x4 LB: > { %s3251_s25 = sadd.s32 4294967295, %s3155_s24   ;;  %s3254_s26 = sadd.s32 1, %s3155_s24   ;;  %s3155_s24 = sphi %s3238_s24, %s4075_s24   ;;  %s3151_s23 = sphi %s3236_s23, %s4074_s23   ;;  %s3147_s22 = sphi %s3234_s22, %s4073_s22   ;;  %s3143_s21 = sphi %s3232_s21, %s4072_s21  }
   0x5   : > { %s24_s27 = ssub.s32 %s3155_s24, %s3254_s26  ;;  %s27_s28 = sadd.s32 1, %s3151_s23 }
   0x6   : > { %p25_p0 = scmp.eq.s32.totalorder %s24_s27, 0  ;;  %p34_p1 = scmp.ne.s32.totalorder %s3151_s23, %s3147_s22 }
   0x7   : > { %p35_p2 = scmp.eq.s32.totalorder %s3155_s24, 0  ;;  %p40_p3 = scmp.ne.s32.totalorder %s3147_s22, %s3143_s21 }
   0x8   : > { %s3264_s29 = scalar_select %p25_p0, %s3151_s23, %s27_s28  }
   0x9   : > { %p3266_p4 = por %p35_p2, %p34_p1  ;;  %p4055_p5 = scmp.eq.s32.totalorder %s3251_s25, 0 }
   0xa   : > { %p174_p6 = scmp.eq.s32.totalorder %s3251_s25, 1  ;;  %p2284_p7 = scmp.ge.s32.totalorder %s3155_s24, 1 }
   0xb   : > { %s4058_s30 = scalar_select %p3266_p4, 1, 0 }
   0xc   : > { %p3275_p8 = por %p4055_p5, %p40_p3  ;;  %p187_p9 = scmp.lt.s32.totalorder %s3155_s24, 3 }
   0xd   : > { %p3280_p10 = por %p174_p6, %p34_p1  ;;  %s3189_s10 = smov [#allocation4]  }
   0xe   : > { %s4059_s7 = scalar_select %p3275_p8, 1, 0 }
   0xf   : > { %s4060_s8 = scalar_select %p3280_p10, 1, 0 }
  0x10   : > { %p3284_p11 = pnand %p2284_p7, %p187_p9  ;;  %s199_s11 = sshll.u32 %s3189_s10, 4  ;;  %s200_s11 = int_to_ptr.vmem [resolvable:$true] %s199_s11 }
  0x11   : > { %s3029_s15 = scalar_lea.hbm %s4049_s1, 6272 }
  0x12   : > { %s4061_s9 = scalar_select %p3284_p11, 1, 0 }
  0x13   : > { %p2741_p12 = pneg %p3284_p11  ;;  %p3030_p0 = scmp.ne.s32.totalorder %s4049_s1, %s3029_s15 }
  0x14   : > { %p3036_p6 = scmp.lt.u32.totalorder %s3029_s15, %s4049_s1 }
  0x15   : > { %p3292_p13 = pnand %p2741_p12, %p4055_p5 }
  0x17   : > { %p3031_p1 = pneg %p3292_p13 }
  0x19   : > { %p3032_p2 = pnand %p3031_p1, %p3030_p0 }
  0x1b   : > { %p3033_p3 = pneg %p3032_p2 }
  0x1d   : > { %p3038_p7 = pnand %p3036_p6, %p3033_p3 }
  0x1f   : > { %3041 = shalt.err (!%p3038_p7)
}
  0x20   : > { %s3042_s20 = scalar_lea.vmem %s200_s11, 6272  ;;  %p3050_p10 = scmp.lt.s32.totalorder %s200_s11, %s200_s11 }
  0x21   : > { %p3043_p9 = scmp.ne.s32.totalorder %s200_s11, %s3042_s20  ;;  %p3051_p8 = scmp.lt.s32.totalorder %s3042_s20, %s3042_s20 }
  0x23   : > { %p3045_p12 = pnand %p3043_p9, %p3031_p1  ;;  %p3052_p11 = por %p3051_p8, %p3050_p10 }
  0x25   : > { %p3046_p5 = pneg %p3045_p12 }
  0x27   : > { %p3053_p4 = pnand %p3052_p11, %p3046_p5 }
  0x29   : > { %3056 = shalt.err (!%p3053_p4)
}
  0x2a   : > { %s3190_s21 = smov 64   ;;  %s3191_s27 = smov 4  }
  0x2b   : > { %2744 = dma.hbm_to_vmem [thread:$0]  (!%p3292_p13), %s4049_s1, 6272, %s200_s11, [#allocation5], %s3190_s21, %s3190_s21, %s3191_s27  }
  0x2c   : > { %p2286_p0 = scmp.ge.s32.totalorder %s3155_s24, 2 }
  0x2d   : > { %p4063_p2 = scmp.ne.s32.totalorder (!%p2286_p0), %s4058_s30, 0 }
  0x2e   : > { %218 = sbr.rel (%p2286_p0) target bundleno = 89 (0x59), region = 32 }
  0x35   : > { %221 = sbr.rel (!%p4063_p2) target bundleno = 89 (0x59), region = 36  ;;  %s222_s13 = sand.u32 (%p4063_p2), 1, %s3151_s23  }
  0x36   : > { %s2287_s14 = sshll.u32 (%p4063_p2), %s3155_s24, 4  ;;  %s2733_s15 = smul.u32 (%p4063_p2), 896, %s222_s13 }
  0x37   : > { %s228_s16 = ssub.s32 (%p4063_p2), 25, %s2287_s14  ;;  %s3320_s18 = scalar_lea.sflag (%p4063_p2), [#allocation3], %s222_s13 }
  0x38   : > { %p229_p4 = scmp.lt.s32.totalorder (%p4063_p2), %s228_s16, 16  ;;  %s226_s11 = scalar_lea.vmem (%p4063_p2), [#allocation2], %s2733_s15 }
  0x3c   : > { %s4077_s16 = smov (!%p229_p4, %s228_s16), 16 }
  0x3d   : > { %s3317_s17 = smul.u32 896, %s4077_s16 }
  0x3f   : > { %s234_s12 = ssub.s32 14336, %s3317_s17 }
  0x40   : > { %235 = vsyncadd %s3320_s18, %s234_s12  ;;  %p2290_p5 = scmp.ne.s32.totalorder %s3317_s17, 0  ;;  %s2734_s30 = smul.u32 14336, %s3155_s24 }
  0x41   : > { %s241_s19 = sshll.u32 %s226_s11, 4  ;;  %s3061_s24 = scalar_lea.hbm %s4048_s0, 22400  ;;  %s3330_s19 = int_to_ptr.vmem [resolvable:$true] %s241_s19 }
  0x42   : > { %s3328_s27 = scalar_lea.hbm %s4048_s0, %s2734_s30 }
  0x43   : > { %s3057_s28 = scalar_lea.hbm %s3328_s27, %s3317_s17  ;;  %p3062_p13 = scmp.lt.u32.totalorder %s3328_s27, %s4048_s0 }
  0x44   : > { %p3058_p8 = scmp.ne.s32.totalorder %s3328_s27, %s3057_s28  ;;  %p3063_p1 = scmp.lt.u32.totalorder %s3061_s24, %s3057_s28 }
  0x45   : > { %p3065_p6 = scmp.lt.u32.totalorder %s3057_s28, %s3328_s27 }
  0x46   : > { %p3059_p10 = pnand %p3058_p8, %p2290_p5  ;;  %p3064_p3 = por %p3063_p1, %p3062_p13 }
  0x48   : > { %p3060_p11 = pneg %p3059_p10  ;;  %p3066_p7 = por %p3065_p6, %p3064_p3 }
  0x4a   : > { %p3067_p9 = pnand %p3066_p7, %p3060_p11 }
  0x4c   : > { %3070 = shalt.err (!%p3067_p9)
}
  0x4d   : > { %s3071_s16 = scalar_lea.vmem %s3330_s19, %s3317_s17  ;;  %s3192_s12 = smov [#allocation2]  }
  0x4e   : > { %p3072_p12 = scmp.ne.s32.totalorder %s3330_s19, %s3071_s16  ;;  %s3075_s11 = sshll.u32 %s3192_s12, 4  ;;  %s3076_s11 = int_to_ptr.vmem [resolvable:$false] %s3075_s11 }
  0x4f   : > { %s3077_s30 = scalar_lea.vmem %s3076_s11, 28672  ;;  %p3078_p4 = scmp.lt.s32.totalorder %s3330_s19, %s3076_s11 }
  0x50   : > { %p3073_p0 = pnand %p3072_p12, %p2290_p5  ;;  %p3079_p8 = scmp.lt.s32.totalorder %s3077_s30, %s3071_s16 }
  0x52   : > { %p3074_p2 = pneg %p3073_p0  ;;  %p3080_p10 = por %p3079_p8, %p3078_p4 }
  0x54   : > { %p3081_p13 = pnand %p3080_p10, %p3074_p2 }
  0x56   : > { %3084 = shalt.err (!%p3081_p13)
}
  0x57   : > { %s3193_s20 = smov 896   ;;  %s3194_s21 = smov 56  }
  0x58   : > { %247 = dma.hbm_to_vmem [thread:$0]  (%p2290_p5), %s3328_s27, %s3317_s17, %s3330_s19, %s3320_s18, %s3193_s20, %s3193_s20, %s3194_s21  }
  0x59 PF: > { %p4064_p11 = scmp.ne.s32.totalorder %s4061_s9, 0 }
  0x5a   : > { %s3360_s28 = sand.u32 (!%p4064_p11), 1, %s3147_s22   ;;  %p4065_p1 = scmp.ne.s32.totalorder (!%p4064_p11), %s4059_s7, 0 }
  0x5b   : > { %270 = sbr.rel (%p4064_p11) target bundleno = 1232 (0x4d0), region = 44  ;;  %s273_s13 = scalar_lea.sflag (!%p4064_p11), [#allocation3], %s3360_s28 }
  0x5c   : > { %s2735_s10 = smul.u32 (!%p4064_p11), 896, %s3360_s28 }
  0x5e   : > { %s3364_s24 = scalar_lea.vmem (!%p4064_p11), [#allocation2], %s2735_s10 }
  0x62   : > { %3134 = dma.done.wait (%p4065_p1), %s273_s13, 14336  }
  0x63   : > { %3136 = vsyncadd (%p4065_p1), %s273_s13, 4294952960  ;;  %p4066_p5 = scmp.eq.s32.totalorder %s3251_s25, 0 }
  0x65   : > { %3138 = dma.done.wait (%p4066_p5), [#allocation5], 6272   ;;  %p4067_p3 = pmov %p4066_p5 }
  0x66   : > { %v2852_v0 = vld [vmem:[#allocation4 + $0x40] sm:$0xff]   ;;  %v2856_v4 = vld [vmem:[#allocation4 + $0x48] sm:$0xff]   ;;  %v2860_v8 = vld [vmem:[#allocation4 + $0x50] sm:$0xff]   ;;  %vm910_vm0 = vcmask 130048   ;;  %s3568_s7 = sshll.u32 %s3251_s25, 4  ;;  %vm1571_vm1 = vcmask 80896  }
  0x67   : > { %3140 = vsyncadd (%p4067_p3), [#allocation5], 4294961024  ;;  %v2853_v1 = vld [vmem:[#allocation4] sm:$0xff]   ;;  %2394 = vmatprep.subr.bf16.mxu0 %v2852_v0  ;;  %v2857_v5 = vld [vmem:[#allocation4 + $0x8] sm:$0xff]   ;;  %p328_p6 = scmp.lt.s32.totalorder %s3568_s7, 24  ;;  %s2296_s16 = sshll.u32 %s3360_s28, 7 }
  0x68   : > { %v2854_v2 = vld [vmem:[#allocation4 + $0xc0] sm:$0xff]   ;;  %2395 = vmatpush3.bf16.msra.mxu0 %v2853_v1  ;;  %v2858_v6 = vld [vmem:[#allocation4 + $0xc8] sm:$0xff]   ;;  %v2861_v9 = vld [vmem:[#allocation4 + $0x10] sm:$0xff]   ;;  %s3911_s12 = scalar_lea.vmem [#allocation6], %s2296_s16   ;;  %p4068_p7 = scmp.ne.s32.totalorder %s4060_s8, 0 }
  0x69   : > { %v2855_v3 = vld [vmem:[#allocation4 + $0x80] sm:$0xff]   ;;  %2458 = vmatprep.subr.bf16.mxu1 %v2854_v2  ;;  %2396 = vmatprep.subr.bf16.mxu0 %v2856_v4  ;;  %v2859_v7 = vld [vmem:[#allocation4 + $0x88] sm:$0xff]   ;;  %v2862_v10 = vld [vmem:[#allocation4 + $0xd0] sm:$0xff]   ;;  %s329_s9 = scalar_select %p328_p6, %s3568_s7, 24 }
  0x6a   : > { %2459 = vmatpush3.bf16.msra.mxu1 %v2855_v3  ;;  %v2863_v11 = vld [vmem:[#allocation4 + $0x90] sm:$0xff]   ;;  %v2864_v12 = vld [vmem:[#allocation4 + $0x58] sm:$0xff]   ;;  %v2868_v16 = vld [vmem:[#allocation4 + $0x60] sm:$0xff]   ;;  %s1983_s28 = ssub.s32 (%p4068_p7), 25, %s3568_s7  ;;  %s2391_s11 = sshll.u32 (%p4068_p7), %s3251_s25, 7 }
  0x6b   : > { %2460 = vmatprep.subr.bf16.mxu1 %v2858_v6  ;;  %v2865_v13 = vld [vmem:[#allocation4 + $0x18] sm:$0xff]   ;;  %v2869_v17 = vld [vmem:[#allocation4 + $0x20] sm:$0xff]   ;;  %v2872_v20 = vld [vmem:[#allocation4 + $0x68] sm:$0xff]   ;;  %s2298_s17 = sshll.u32 %s329_s9, 3  ;;  %p1984_p9 = scmp.lt.s32.totalorder (%p4068_p7), %s1983_s28, 16 }
  0x6c   : > { %2397 = vmatpush3.bf16.msra.mxu0 %v2857_v5  ;;  %v2866_v14 = vld [vmem:[#allocation4 + $0xd8] sm:$0xff]   ;;  %v2870_v18 = vld [vmem:[#allocation4 + $0xe0] sm:$0xff]   ;;  %v2873_v21 = vld [vmem:[#allocation4 + $0x28] sm:$0xff]   ;;  %s3580_s27 = scalar_lea.vmem %s4053_s5, %s2298_s17  ;;  %s3952_s21 = scalar_lea.vmem (%p4068_p7), %s4054_s6, %s2391_s11  }
  0x6d   : > { %2398 = vmatprep.subr.bf16.mxu0 %v2860_v8  ;;  %v2867_v15 = vld [vmem:[#allocation4 + $0x98] sm:$0xff]   ;;  %v2871_v19 = vld [vmem:[#allocation4 + $0xa0] sm:$0xff]   ;;  %v2874_v22 = vld [vmem:[#allocation4 + $0xe8] sm:$0xff]  }
  0x6e   : > { %2461 = vmatpush3.bf16.msra.mxu1 %v2859_v7  ;;  %v2875_v23 = vld [vmem:[#allocation4 + $0xa8] sm:$0xff]   ;;  %v2876_v24 = vld [vmem:[#allocation4 + $0x70] sm:$0xff]   ;;  %v2880_v28 = vld [vmem:[#allocation4 + $0x78] sm:$0xff]  }
  0x6f   : > { %2462 = vmatprep.subr.bf16.mxu1 %v2862_v10  ;;  %v2877_v25 = vld [vmem:[#allocation4 + $0x30] sm:$0xff]   ;;  %v2881_v29 = vld [vmem:[#allocation4 + $0x38] sm:$0xff]   ;;  %v344_v31 = vld [vmem:[%s3364_s24 + $0x8] sm:$0xff] }
  0x70   : > { %2399 = vmatpush3.bf16.msra.mxu0 %v2861_v9  ;;  %v2878_v26 = vld [vmem:[#allocation4 + $0xf0] sm:$0xff]   ;;  %v2882_v30 = vld [vmem:[#allocation4 + $0xf8] sm:$0xff]   ;;  %v351_v32 = vld [vmem:[%s3364_s24 + $0x40] sm:$0xff] }
  0x71   : > { %2400 = vmatprep.subr.bf16.mxu0 %v2864_v12  ;;  %v2879_v27 = vld [vmem:[#allocation4 + $0xb0] sm:$0xff]   ;;  %v456_v33 = vpack.c.bf16 %v351_v32, %v344_v31  ;;  %v2883_v34 = vld [vmem:[#allocation4 + $0xb8] sm:$0xff]   ;;  %v343_v35 = vld [vmem:[%s3364_s24] sm:$0xff] }
  0x72   : > { %2463 = vmatpush3.bf16.msra.mxu1 %v2863_v11  ;;  %v350_v36 = vld [vmem:[%s3364_s24 + $0x38] sm:$0xff]  ;;  %v2884_v38 = vld [vmem:[#allocation4 + $0x140] sm:$0xff]   ;;  %v353_v40 = vld [vmem:[%s3364_s24 + $0x50] sm:$0xff] }
  0x73   : > { %2464 = vmatprep.subr.bf16.mxu1 %v2866_v14  ;;  %967 = vmatprep.mubr.bf16.mxu0 %v456_v33  ;;  %v455_v37 = vpack.c.bf16 %v350_v36, %v343_v35  ;;  %v346_v39 = vld [vmem:[%s3364_s24 + $0x18] sm:$0xff]  ;;  %v2885_v42 = vld [vmem:[#allocation4 + $0x100] sm:$0xff]   ;;  %v345_v43 = vld [vmem:[%s3364_s24 + $0x10] sm:$0xff] }
  0x74   : > { %2401 = vmatpush3.bf16.msra.mxu0 %v2865_v13  ;;  %v458_v41 = vpack.c.bf16 %v353_v40, %v346_v39  ;;  %v352_v44 = vld [vmem:[%s3364_s24 + $0x48] sm:$0xff]  ;;  %v358_v45 = vld [vmem:[%s3364_s24 + $0x78] sm:$0xff]  ;;  %v365_v47 = vld [vmem:[%s3364_s24 + $0xb0] sm:$0xff] }
  0x75   : > { %2402 = vmatprep.subr.bf16.mxu0 %v2868_v16  ;;  %v457_v46 = vpack.c.bf16 %v352_v44, %v345_v43  ;;  %v357_v48 = vld [vmem:[%s3364_s24 + $0x70] sm:$0xff]  ;;  %v364_v49 = vld [vmem:[%s3364_s24 + $0xa8] sm:$0xff]  ;;  %v463_v50 = vpack.c.bf16 %v365_v47, %v358_v45  ;;  %v367_v53 = vld [vmem:[%s3364_s24 + $0xc0] sm:$0xff] }
  0x76   : > { %2465 = vmatpush3.bf16.msra.mxu1 %v2867_v15  ;;  %1064 = vmatprep.mubr.bf16.mxu1 %v458_v41  ;;  %v2886_v51 = vld [vmem:[#allocation4 + $0x148] sm:$0xff]   ;;  %v462_v54 = vpack.c.bf16 %v364_v49, %v357_v48  ;;  %v359_v57 = vld [vmem:[%s3364_s24 + $0x80] sm:$0xff]  ;;  %v366_v58 = vld [vmem:[%s3364_s24 + $0xb8] sm:$0xff] }
  0x77   : > { %2466 = vmatprep.subr.bf16.mxu1 %v2870_v18  ;;  %v360_v52 = vld [vmem:[%s3364_s24 + $0x88] sm:$0xff]  ;;  %v379_v60 = vld [vmem:[%s3364_s24 + $0x120] sm:$0xff]  ;;  %v464_v62 = vpack.c.bf16 %v366_v58, %v359_v57  ;;  %v2888_v63 = vld [vmem:[#allocation4 + $0x150] sm:$0xff]  }
  0x78   : > { %2403 = vmatpush3.bf16.msra.mxu0 %v2869_v17  ;;  %v465_v55 = vpack.c.bf16 %v367_v53, %v360_v52  ;;  %v2887_v56 = vld [vmem:[#allocation4 + $0x108] sm:$0xff]   ;;  %v374_v0 = vld [vmem:[%s3364_s24 + $0xf8] sm:$0xff]  ;;  %v381_v1 = vld [vmem:[%s3364_s24 + $0x130] sm:$0xff] }
  0x79   : > { %2404 = vmatprep.subr.bf16.mxu0 %v2872_v20  ;;  %v372_v59 = vld [vmem:[%s3364_s24 + $0xe8] sm:$0xff]  ;;  %v371_v2 = vld [vmem:[%s3364_s24 + $0xe0] sm:$0xff]  ;;  %v378_v3 = vld [vmem:[%s3364_s24 + $0x118] sm:$0xff]  ;;  %v472_v4 = vpack.c.bf16 %v381_v1, %v374_v0 }
  0x7a   : > { %2467 = vmatpush3.bf16.msra.mxu1 %v2871_v19  ;;  %v470_v61 = vpack.c.bf16 %v379_v60, %v372_v59  ;;  %v2889_v5 = vld [vmem:[#allocation4 + $0x110] sm:$0xff]   ;;  %v386_v7 = vld [vmem:[%s3364_s24 + $0x158] sm:$0xff]  ;;  %v380_v9 = vld [vmem:[%s3364_s24 + $0x128] sm:$0xff]  ;;  %v469_v10 = vpack.c.bf16 %v378_v3, %v371_v2 }
  0x7b   : > { %2468 = vmatprep.subr.bf16.mxu1 %v2874_v22  ;;  %v373_v6 = vld [vmem:[%s3364_s24 + $0xf0] sm:$0xff]  ;;  %v2890_v11 = vld [vmem:[#allocation4 + $0x158] sm:$0xff]   ;;  %v388_v12 = vld [vmem:[%s3364_s24 + $0x168] sm:$0xff] }
  0x7c   : > { %2405 = vmatpush3.bf16.msra.mxu0 %v2873_v21  ;;  %v393_v8 = vld [vmem:[%s3364_s24 + $0x190] sm:$0xff]  ;;  %v395_v13 = vld [vmem:[%s3364_s24 + $0x1a0] sm:$0xff]  ;;  %v2891_v15 = vld [vmem:[#allocation4 + $0x118] sm:$0xff]   ;;  %v471_v16 = vpack.c.bf16 %v380_v9, %v373_v6 }
  0x7d   : > { %2406 = vmatprep.subr.bf16.mxu0 %v2876_v24  ;;  %v477_v14 = vpack.c.bf16 %v393_v8, %v386_v7  ;;  %v2892_v17 = vld [vmem:[#allocation4 + $0x180] sm:$0xff]   ;;  %v385_v18 = vld [vmem:[%s3364_s24 + $0x150] sm:$0xff]  ;;  %v392_v19 = vld [vmem:[%s3364_s24 + $0x188] sm:$0xff]  ;;  %v479_v20 = vpack.c.bf16 %v395_v13, %v388_v12 }
  0x7e   : > { %2469 = vmatpush3.bf16.msra.mxu1 %v2875_v23  ;;  %v2893_v21 = vld [vmem:[#allocation4 + $0x160] sm:$0xff]   ;;  %v400_v22 = vld [vmem:[%s3364_s24 + $0x1c8] sm:$0xff]  ;;  %v406_v36 = vld [vmem:[%s3364_s24 + $0x1f8] sm:$0xff] }
  0x7f   : > { %2470 = vmatprep.subr.bf16.mxu1 %v2878_v26  ;;  %v407_v23 = vld [vmem:[%s3364_s24 + $0x200] sm:$0xff]  ;;  %v2895_v31 = vld [vmem:[#allocation4 + $0x168] sm:$0xff]   ;;  %v401_v39 = vld [vmem:[%s3364_s24 + $0x1d0] sm:$0xff] }
  0x80   : > { %2407 = vmatpush3.bf16.msra.mxu0 %v2877_v25  ;;  %v2894_v24 = vld [vmem:[#allocation4 + $0x120] sm:$0xff]   ;;  %v476_v25 = vpack.c.bf16 %v392_v19, %v385_v18  ;;  %v408_v40 = vld [vmem:[%s3364_s24 + $0x208] sm:$0xff]  ;;  %v2897_v41 = vld [vmem:[#allocation4 + $0x170] sm:$0xff]  }
  0x81   : > { %2408 = vmatprep.subr.bf16.mxu0 %v2880_v28  ;;  %v387_v26 = vld [vmem:[%s3364_s24 + $0x160] sm:$0xff]  ;;  %v484_v28 = vpack.c.bf16 %v407_v23, %v400_v22  ;;  %v2898_v43 = vld [vmem:[#allocation4 + $0x130] sm:$0xff]   ;;  %v416_v45 = vld [vmem:[%s3364_s24 + $0x248] sm:$0xff]  ;;  %v485_v47 = vpack.c.bf16 %v408_v40, %v401_v39 }
  0x82   : > { %2471 = vmatpush3.bf16.msra.mxu1 %v2879_v27  ;;  %v394_v27 = vld [vmem:[%s3364_s24 + $0x198] sm:$0xff]  ;;  %v399_v35 = vld [vmem:[%s3364_s24 + $0x1c0] sm:$0xff]  ;;  %v413_v49 = vld [vmem:[%s3364_s24 + $0x230] sm:$0xff] }
  0x83   : > { %2472 = vmatprep.subr.bf16.mxu1 %v2882_v30  ;;  %v409_v30 = vld [vmem:[%s3364_s24 + $0x210] sm:$0xff]  ;;  %v478_v32 = vpack.c.bf16 %v394_v27, %v387_v26  ;;  %v2899_v48 = vld [vmem:[#allocation4 + $0x178] sm:$0xff]   ;;  %v428_v53 = vld [vmem:[%s3364_s24 + $0x2a8] sm:$0xff] }
  0x84   : > { %2409 = vmatpush3.bf16.msra.mxu0 %v2881_v29  ;;  %v402_v29 = vld [vmem:[%s3364_s24 + $0x1d8] sm:$0xff]  ;;  %v437_v60 = vld [vmem:[%s3364_s24 + $0x2f0] sm:$0xff]  ;;  %v444_v7 = vld [vmem:[%s3364_s24 + $0x328] sm:$0xff] }
  0x85   : > { %2522 = vmatprep.subr.bf16.mxu0 %v2884_v38  ;;  %v486_v33 = vpack.c.bf16 %v409_v30, %v402_v29  ;;  %v421_v38 = vld [vmem:[%s3364_s24 + $0x270] sm:$0xff]  ;;  %v2900_v52 = vld [vmem:[#allocation4 + $0x138] sm:$0xff]   ;;  %v451_v8 = vld [vmem:[%s3364_s24 + $0x360] sm:$0xff] }
  0x86   : > { %2473 = vmatpush3.bf16.msra.mxu1 %v2883_v34  ;;  %v2896_v34 = vld [vmem:[#allocation4 + $0x128] sm:$0xff]   ;;  %v422_v57 = vld [vmem:[%s3364_s24 + $0x278] sm:$0xff]  ;;  %v449_v2 = vld [vmem:[%s3364_s24 + $0x350] sm:$0xff] }
  0x87   : > { %968 = vmatmul.mubr.bf16.vlgmr.msra.gmra.mrb[0].mxu0 %v455_v37  ;;  %2627 = vmatprep.subr.bf16.mxu1 %v2892_v17  ;;  %v414_v37 = vld [vmem:[%s3364_s24 + $0x238] sm:$0xff]  ;;  %v448_v12 = vld [vmem:[%s3364_s24 + $0x348] sm:$0xff]  ;;  %v349_v19 = vld [vmem:[%s3364_s24 + $0x30] sm:$0xff] }
  0x88   : > { %2523 = vmatpush3.bf16.msra.mxu0 %v2885_v42  ;;  %975 = vmatprep.mubr.bf16.mxu0 %v463_v50  ;;  %v483_v42 = vpack.c.bf16 %v406_v36, %v399_v35  ;;  %v491_v44 = vpack.c.bf16 %v421_v38, %v414_v37  ;;  %v430_v59 = vld [vmem:[%s3364_s24 + $0x2b8] sm:$0xff]  ;;  %v348_v13 = vld [vmem:[%s3364_s24 + $0x28] sm:$0xff]  ;;  %v347_v23 = vld [vmem:[%s3364_s24 + $0x20] sm:$0xff] }
  0x89   : > { %1065 = vmatmul.mubr.bf16.vlgmr.msra.gmra.mrb[0].mxu1 %v457_v46  ;;  %2524 = vmatprep.subr.bf16.mxu0 %v2886_v51  ;;  %v423_v46 = vld [vmem:[%s3364_s24 + $0x280] sm:$0xff]  ;;  %v420_v51 = vld [vmem:[%s3364_s24 + $0x268] sm:$0xff]  ;;  %v434_v0 = vld [vmem:[%s3364_s24 + $0x2d8] sm:$0xff] }
  0x8a   : > { %1072 = vmatprep.mubr.bf16.mxu1 %v465_v55  ;;  %2628 = vmatpush3.bf16.msra.mxu1 %v2892_v17  ;;  %v493_v50 = vpack.c.bf16 %v423_v46, %v416_v45  ;;  %v490_v55 = vpack.c.bf16 %v420_v51, %v413_v49  ;;  %v442_v1 = vld [vmem:[%s3364_s24 + $0x318] sm:$0xff]  ;;  %v369_v26 = vld [vmem:[%s3364_s24 + $0xd0] sm:$0xff]  ;;  %v368_v36 = vld [vmem:[%s3364_s24 + $0xc8] sm:$0xff] }
  0x8b   : > { %v505_v6 = vpack.c.bf16 %v449_v2, %v442_v1  ;;  %v450_v17 = vld [vmem:[%s3364_s24 + $0x358] sm:$0xff]  ;;  %v361_v35 = vld [vmem:[%s3364_s24 + $0x90] sm:$0xff]  ;;  %v376_v37 = vld [vmem:[%s3364_s24 + $0x108] sm:$0xff] }
  0x8c   : > { %2525 = vmatpush3.bf16.msra.mxu0 %v2887_v56  ;;  %v415_v56 = vld [vmem:[%s3364_s24 + $0x240] sm:$0xff]  ;;  %v370_v29 = vld [vmem:[%s3364_s24 + $0xd8] sm:$0xff]  ;;  %v466_v39 = vpack.c.bf16 %v368_v36, %v361_v35 }
  0x8d   : > { %2526 = vmatprep.subr.bf16.mxu0 %v2888_v63  ;;  %v427_v63 = vld [vmem:[%s3364_s24 + $0x2a0] sm:$0xff]  ;;  %v390_v49 = vld [vmem:[%s3364_s24 + $0x178] sm:$0xff] }
  0x8e   : > { %v497_v3 = vpack.c.bf16 %v434_v0, %v427_v63  ;;  %v383_v38 = vld [vmem:[%s3364_s24 + $0x140] sm:$0xff]  ;;  %v454_v1 = vld [vmem:[%s3364_s24 + $0x378] sm:$0xff] }
  0x8f   : > { %976 = vmatmul.mubr.bf16.gmra.mrb[4].mxu0 %v462_v54  ;;  %v435_v54 = vld [vmem:[%s3364_s24 + $0x2e0] sm:$0xff]  ;;  %v1410_v35 = vld [vmem:[%s4051_s3 + $0x38] sm:$0xff] }
  0x90   : > { %983 = vmatprep.mubr.bf16.mxu0 %v470_v61  ;;  %2527 = vmatpush3.bf16.msra.mxu0 %v2889_v5  ;;  %v498_v58 = vpack.c.bf16 %v435_v54, %v428_v53  ;;  %v492_v61 = vpack.c.bf16 %v422_v57, %v415_v56  ;;  %v436_v5 = vld [vmem:[%s3364_s24 + $0x2e8] sm:$0xff]  ;;  %v391_v40 = vld [vmem:[%s3364_s24 + $0x180] sm:$0xff]  ;;  %v426_v53 = vld [vmem:[%s3364_s24 + $0x298] sm:$0xff] }
  0x91   : > { %1073 = vmatmul.mubr.bf16.gmra.mrb[4].mxu1 %v464_v62  ;;  %2528 = vmatprep.subr.bf16.mxu0 %v2890_v11  ;;  %v500_v62 = vpack.c.bf16 %v437_v60, %v430_v59  ;;  %v441_v11 = vld [vmem:[%s3364_s24 + $0x310] sm:$0xff]  ;;  %v440_v56 = vld [vmem:[%s3364_s24 + $0x308] sm:$0xff]  ;;  %v447_v0 = vld [vmem:[%s3364_s24 + $0x340] sm:$0xff] }
  0x92   : > { %1080 = vmatprep.mubr.bf16.mxu1 %v472_v4  ;;  %v429_v4 = vld [vmem:[%s3364_s24 + $0x2b0] sm:$0xff]  ;;  %v396_v60 = vld [vmem:[%s3364_s24 + $0x1a8] sm:$0xff] }
  0x93   : > { %v499_v9 = vpack.c.bf16 %v436_v5, %v429_v4  ;;  %v389_v59 = vld [vmem:[%s3364_s24 + $0x170] sm:$0xff]  ;;  %v403_v4 = vld [vmem:[%s3364_s24 + $0x1e0] sm:$0xff]  ;;  %v410_v5 = vld [vmem:[%s3364_s24 + $0x218] sm:$0xff] }
  0x94   : > { %2529 = vmatpush3.bf16.msra.mxu0 %v2891_v15  ;;  %v504_v15 = vpack.c.bf16 %v448_v12, %v441_v11  ;;  %v480_v63 = vpack.c.bf16 %v396_v60, %v389_v59  ;;  %v424_v11 = vld [vmem:[%s3364_s24 + $0x288] sm:$0xff] }
  0x95   : > { %2530 = vmatprep.subr.bf16.mxu0 %v2893_v21  ;;  %v432_v12 = vld [vmem:[%s3364_s24 + $0x2c8] sm:$0xff] }
  0x97   : > { %984 = vmatmul.mubr.bf16.gmra.mrb[8].mxu0 %v469_v10  ;;  %v507_v10 = vpack.c.bf16 %v451_v8, %v444_v7  ;;  %v425_v7 = vld [vmem:[%s3364_s24 + $0x290] sm:$0xff]  ;;  %v487_v8 = vpack.c.bf16 %v410_v5, %v403_v4 }
  0x98   : > { %991 = vmatprep.mubr.bf16.mxu0 %v477_v14  ;;  %2531 = vmatpush3.bf16.msra.mxu0 %v2894_v24  ;;  %v355_v14 = vld [vmem:[%s3364_s24 + $0x60] sm:$0xff]  ;;  %v354_v24 = vld [vmem:[%s3364_s24 + $0x58] sm:$0xff] }
  0x99   : > { %1081 = vmatmul.mubr.bf16.gmra.mrb[8].mxu1 %v471_v16  ;;  %2532 = vmatprep.subr.bf16.mxu0 %v2895_v31  ;;  %v443_v16 = vld [vmem:[%s3364_s24 + $0x320] sm:$0xff]  ;;  %v460_v18 = vpack.c.bf16 %v355_v14, %v348_v13  ;;  %v459_v27 = vpack.c.bf16 %v354_v24, %v347_v23  ;;  %v377_v31 = vld [vmem:[%s3364_s24 + $0x110] sm:$0xff]  ;;  %v452_v23 = vld [vmem:[%s3364_s24 + $0x368] sm:$0xff] }
  0x9a   : > { %1088 = vmatprep.mubr.bf16.mxu1 %v479_v20  ;;  %v356_v20 = vld [vmem:[%s3364_s24 + $0x68] sm:$0xff]  ;;  %v506_v21 = vpack.c.bf16 %v450_v17, %v443_v16  ;;  %v439_v13 = vld [vmem:[%s3364_s24 + $0x300] sm:$0xff]  ;;  %v438_v17 = vld [vmem:[%s3364_s24 + $0x2f8] sm:$0xff] }
  0x9b   : > { %v461_v22 = vpack.c.bf16 %v356_v20, %v349_v19  ;;  %v431_v16 = vld [vmem:[%s3364_s24 + $0x2c0] sm:$0xff]  ;;  %v453_v19 = vld [vmem:[%s3364_s24 + $0x370] sm:$0xff] }
  0x9c   : > { %2533 = vmatpush3.bf16.msra.mxu0 %v2896_v34  ;;  %v501_v20 = vpack.c.bf16 %v438_v17, %v431_v16 }
  0x9d   : > { %2534 = vmatprep.subr.bf16.mxu0 %v2897_v41  ;;  %v398_v41 = vld [vmem:[%s3364_s24 + $0x1b8] sm:$0xff] }
  0x9e   : > { %v482_v45 = vpack.c.bf16 %v398_v41, %v391_v40  ;;  %v1413_v40 = vld [vmem:[%s4051_s3 + $0x50] sm:$0xff]  ;;  %v1414_v41 = vld [vmem:[%s4051_s3 + $0x58] sm:$0xff] }
  0x9f   : > { %992 = vmatmul.mubr.bf16.gmra.mrb[12].mxu0 %v476_v25  ;;  %v362_v25 = vld [vmem:[%s3364_s24 + $0x98] sm:$0xff] }
  0xa0   : > { %999 = vmatprep.mubr.bf16.mxu0 %v484_v28  ;;  %2535 = vmatpush3.bf16.msra.mxu0 %v2898_v43  ;;  %v363_v28 = vld [vmem:[%s3364_s24 + $0xa0] sm:$0xff]  ;;  %v467_v30 = vpack.c.bf16 %v369_v26, %v362_v25  ;;  %v405_v43 = vld [vmem:[%s3364_s24 + $0x1f0] sm:$0xff]  ;;  %v1404_v26 = vld [vmem:[%s4051_s3 + $0x8] sm:$0xff] }
  0xa1   : > { %1089 = vmatmul.mubr.bf16.gmra.mrb[12].mxu1 %v478_v32  ;;  %2536 = vmatprep.subr.bf16.mxu0 %v2899_v48  ;;  %v384_v32 = vld [vmem:[%s3364_s24 + $0x148] sm:$0xff]  ;;  %v382_v48 = vld [vmem:[%s3364_s24 + $0x138] sm:$0xff]  ;;  %v1403_v25 = vld [vmem:[%s4051_s3] sm:$0xff] }
  0xa2   : > { %1096 = vmatprep.mubr.bf16.mxu1 %v486_v33  ;;  %v468_v33 = vpack.c.bf16 %v370_v29, %v363_v28  ;;  %v475_v34 = vpack.c.bf16 %v384_v32, %v377_v31  ;;  %v1405_v28 = vld [vmem:[%s4051_s3 + $0x10] sm:$0xff]  ;;  %v1406_v29 = vld [vmem:[%s4051_s3 + $0x18] sm:$0xff]  ;;  %v1407_v31 = vld [vmem:[%s4051_s3 + $0x20] sm:$0xff] }
  0xa3   : > { %v1408_v32 = vld [vmem:[%s4051_s3 + $0x28] sm:$0xff] }
  0xa4   : > { %2537 = vmatpush3.bf16.msra.mxu0 %v2900_v52  ;;  %v419_v52 = vld [vmem:[%s3364_s24 + $0x260] sm:$0xff] }
  0xa5   : > { %v496_v57 = vpack.c.bf16 %v426_v53, %v419_v52 }
  0xa7   : > { %1000 = vmatmul.mubr.bf16.gmra.mrb[16].mxu0 %v483_v42  ;;  %v474_v42 = vpack.c.bf16 %v383_v38, %v376_v37  ;;  %v1411_v37 = vld [vmem:[%s4051_s3 + $0x40] sm:$0xff]  ;;  %v1412_v38 = vld [vmem:[%s4051_s3 + $0x48] sm:$0xff] }
  0xa8   : > { %1007 = vmatprep.mubr.bf16.mxu0 %v491_v44  ;;  %v412_v44 = vld [vmem:[%s3364_s24 + $0x228] sm:$0xff] }
  0xa9   : > { %1097 = vmatmul.mubr.bf16.gmra.mrb[16].mxu1 %v485_v47  ;;  %v489_v46 = vpack.c.bf16 %v412_v44, %v405_v43  ;;  %v375_v47 = vld [vmem:[%s3364_s24 + $0x100] sm:$0xff]  ;;  %v1416_v44 = vld [vmem:[%s4051_s3 + $0x68] sm:$0xff] }
  0xaa   : > { %1104 = vmatprep.mubr.bf16.mxu1 %v493_v50  ;;  %v397_v50 = vld [vmem:[%s3364_s24 + $0x1b0] sm:$0xff]  ;;  %v473_v51 = vpack.c.bf16 %v382_v48, %v375_v47  ;;  %v1415_v43 = vld [vmem:[%s4051_s3 + $0x60] sm:$0xff]  ;;  %v1418_v47 = vld [vmem:[%s4051_s3 + $0x78] sm:$0xff] }
  0xab   : > { %v481_v54 = vpack.c.bf16 %v397_v50, %v390_v49  ;;  %v3545_v50 = vld [vmem:[%s4050_s2] ss:$0 sm:$0xff] }
  0xaf   : > { %1008 = vmatmul.mubr.bf16.gmra.mrb[20].mxu0 %v490_v55  ;;  %v433_v55 = vld [vmem:[%s3364_s24 + $0x2d0] sm:$0xff] }
  0xb0   : > { %1015 = vmatprep.mubr.bf16.mxu0 %v498_v58  ;;  %v503_v58 = vpack.c.bf16 %v440_v56, %v433_v55 }
  0xb1   : > { %1105 = vmatmul.mubr.bf16.gmra.mrb[20].mxu1 %v492_v61  ;;  %v404_v61 = vld [vmem:[%s3364_s24 + $0x1e8] sm:$0xff] }
  0xb2   : > { %1112 = vmatprep.mubr.bf16.mxu1 %v500_v62  ;;  %v411_v62 = vld [vmem:[%s3364_s24 + $0x220] sm:$0xff] }
  0xb3   : > { %v488_v2 = vpack.c.bf16 %v411_v62, %v404_v61 }
  0xb7   : > { %1016 = vmatmul.mubr.bf16.gmra.mrb[24].mxu0 %v497_v3  ;;  %v510_v3 = vpack.c.bf16 %v454_v1, %v447_v0 }
  0xb8   : > { %1023 = vmatprep.mubr.bf16.mxu0 %v505_v6  ;;  %v418_v6 = vld [vmem:[%s3364_s24 + $0x258] sm:$0xff] }
  0xb9   : > { %1113 = vmatmul.mubr.bf16.gmra.mrb[24].mxu1 %v499_v9  ;;  %v495_v9 = vpack.c.bf16 %v425_v7, %v418_v6 }
  0xba   : > { %1120 = vmatprep.mubr.bf16.mxu1 %v507_v10  ;;  %v417_v10 = vld [vmem:[%s3364_s24 + $0x250] sm:$0xff] }
  0xbb   : > { %v494_v14 = vpack.c.bf16 %v424_v11, %v417_v10 }
  0xbf   : > { %1024 = vmatmul.mubr.bf16.gmra.mrb[28].mxu0 %v504_v15  ;;  %v502_v15 = vpack.c.bf16 %v439_v13, %v432_v12 }
  0xc0   : > { %1161 = vmatprep.mubr.bf16.mxu0 %v460_v18  ;;  %v446_v18 = vld [vmem:[%s3364_s24 + $0x338] sm:$0xff] }
  0xc1   : > { %1121 = vmatmul.mubr.bf16.gmra.mrb[28].mxu1 %v506_v21  ;;  %v509_v21 = vpack.c.bf16 %v453_v19, %v446_v18 }
  0xc2   : > { %2629 = vmatprep.mubr.msk.bf16.mxu1 %vm910_vm0, %v461_v22  ;;  %v445_v22 = vld [vmem:[%s3364_s24 + $0x330] sm:$0xff] }
  0xc3   : > { %v508_v24 = vpack.c.bf16 %v452_v23, %v445_v22 }
  0xc7   : > { %1162 = vmatmul.mubr.bf16.vlgmr.msra.gmra.mrb[32].mxu0 %v459_v27  ;;  %v2701_v27 = vpack.c.bf16 %v1404_v26, %v1403_v25 }
  0xc8   : > { %1169 = vmatprep.mubr.bf16.mxu0 %v467_v30  ;;  %v2705_v30 = vpack.c.bf16 %v1406_v29, %v1405_v28 }
  0xc9   : > { %2630 = vmatmul.mubr.msk.bf16.vlgmr.msra.gmra.mrb[32].mxu1 %vm910_vm0, %v468_v33  ;;  %2702 = vmatprep.subr.bf16.mxu1 %v2701_v27  ;;  %v2709_v33 = vpack.c.bf16 %v1408_v32, %v1407_v31 }
  0xca   : > { %2633 = vmatprep.mubr.msk.bf16.mxu1 %vm910_vm0, %v475_v34  ;;  %2704 = vmatpush3.bf16.msra.mxu1 %v2701_v27  ;;  %v1409_v34 = vld [vmem:[%s4051_s3 + $0x30] sm:$0xff] }
  0xcb   : > { %2706 = vmatprep.subr.bf16.mxu1 %v2705_v30  ;;  %v2713_v36 = vpack.c.bf16 %v1410_v35, %v1409_v34 }
  0xce   : > { %2708 = vmatpush3.bf16.msra.mxu1 %v2705_v30 }
  0xcf   : > { %1170 = vmatmul.mubr.bf16.gmra.mrb[36].mxu0 %v466_v39  ;;  %2710 = vmatprep.subr.bf16.mxu1 %v2709_v33  ;;  %v2717_v39 = vpack.c.bf16 %v1412_v38, %v1411_v37 }
  0xd0   : > { %1177 = vmatprep.mubr.bf16.mxu0 %v474_v42  ;;  %v2721_v42 = vpack.c.bf16 %v1414_v41, %v1413_v40 }
  0xd1   : > { %2634 = vmatmul.mubr.msk.bf16.gmra.mrb[36].mxu1 %vm910_vm0, %v482_v45  ;;  %v2725_v45 = vpack.c.bf16 %v1416_v44, %v1415_v43 }
  0xd2   : > { %2637 = vmatprep.mubr.msk.bf16.mxu1 %vm910_vm0, %v489_v46  ;;  %2712 = vmatpush3.bf16.msra.mxu1 %v2709_v33  ;;  %v1417_v46 = vld [vmem:[%s4051_s3 + $0x70] sm:$0xff] }
  0xd3   : > { %2714 = vmatprep.subr.bf16.mxu1 %v2713_v36  ;;  %v2729_v48 = vpack.c.bf16 %v1418_v47, %v1417_v46 }
  0xd6   : > { %2716 = vmatpush3.bf16.msra.mxu1 %v2713_v36 }
  0xd7   : > { %1178 = vmatmul.mubr.bf16.gmra.mrb[40].mxu0 %v473_v51  ;;  %2718 = vmatprep.subr.bf16.mxu1 %v2717_v39 }
  0xd8   : > { %1185 = vmatprep.mubr.bf16.mxu0 %v481_v54 }
  0xd9   : > { %2638 = vmatmul.mubr.msk.bf16.gmra.mrb[40].mxu1 %vm910_vm0, %v496_v57 }
  0xda   : > { %2641 = vmatprep.mubr.msk.bf16.mxu1 %vm910_vm0, %v503_v58  ;;  %2720 = vmatpush3.bf16.msra.mxu1 %v2717_v39 }
  0xdb   : > { %2722 = vmatprep.subr.bf16.mxu1 %v2721_v42 }
  0xde   : > { %2724 = vmatpush3.bf16.msra.mxu1 %v2721_v42 }
  0xdf   : > { %1186 = vmatmul.mubr.bf16.gmra.mrb[44].mxu0 %v480_v63  ;;  %2726 = vmatprep.subr.bf16.mxu1 %v2725_v45 }
  0xe0   : > { %1193 = vmatprep.mubr.bf16.mxu0 %v488_v2 }
  0xe1   : > { %2642 = vmatmul.mubr.msk.bf16.gmra.mrb[44].mxu1 %vm910_vm0, %v510_v3 }
  0xe2   : > { %2728 = vmatpush3.bf16.msra.mxu1 %v2725_v45 }
  0xe3   : > { %2730 = vmatprep.subr.bf16.mxu1 %v2729_v48 }
  0xe6   : > { %2732 = vmatpush3.bf16.msra.mxu1 %v2729_v48 }
  0xe7   : > { %1194 = vmatmul.mubr.bf16.gmra.mrb[48].mxu0 %v487_v8 }
  0xe8   : > { %1201 = vmatprep.mubr.bf16.mxu0 %v495_v9 }
  0xef   : > { %1202 = vmatmul.mubr.bf16.gmra.mrb[52].mxu0 %v494_v14 }
  0xf0   : > { %1209 = vmatprep.mubr.bf16.mxu0 %v502_v15 }
  0xf7   : > { %1210 = vmatmul.mubr.bf16.gmra.mrb[56].mxu0 %v501_v20 }
  0xf8   : > { %1217 = vmatprep.mubr.bf16.mxu0 %v509_v21 }
  0xff   : > { %1218 = vmatmul.mubr.bf16.gmra.mrb[60].mxu0 %v508_v24 }
 0x15a   : > { %v2410_v49 = vpop.f32.mrb[0].mxu0 }
 0x15b   : > { %v2411_v51 = vpop.f32.mrb[1].mxu0 }
 0x15c   : > { %v2412_v52 = vadd.f32 %v2411_v51, %v2410_v49  ;;  %v2413_v53 = vpop.f32.mrb[2].mxu0  ;;  %v2474_v54 = vpop.f32.mrb[0].mxu1  ;;  %v3195_v49 = vmov 0  }
 0x15d   : > { %v2414_v55 = vpop.f32.mrb[3].mxu0  ;;  %v2475_v58 = vpop.f32.mrb[1].mxu1  ;;  %2851 = vset.pattern.permute.xlu1 %v3195_v49  ;;  %2850 = vset.pattern.permute.xlu0 %v3195_v49 }
 0x15e   : > { %v970_v56 = vadd.f32 %v2412_v52, %v3545_v50  ;;  %v2415_v57 = vadd.f32 %v2414_v55, %v2413_v53  ;;  %v2476_v59 = vadd.f32 %v2475_v58, %v2474_v54  ;;  %v2477_v60 = vpop.f32.mrb[2].mxu1 }
 0x15f   : > { %v2478_v62 = vpop.f32.mrb[3].mxu1 }
 0x160   : > { %v973_v61 = vadd.f32 %v2415_v57, %v3545_v50  ;;  %v3549_v63 = vadd.f32 %v2476_v59, %v970_v56  ;;  %v2479_v0 = vadd.f32 %v2478_v62, %v2477_v60 }
 0x162   : > { %v2416_v1 = vpop.f32.mrb[4].mxu0  ;;  %v3551_v2 = vadd.f32 %v2479_v0, %v973_v61  ;;  %v1767_v0 = vld [vmem:[%s3580_s27 + $0x8] sm:$0xff] }
 0x163   : > { %v2417_v3 = vpop.f32.mrb[5].mxu0  ;;  %1786 = vperm.xlu1 %2851, %v1767_v0  }
 0x164   : > { %v2418_v4 = vadd.f32 %v2417_v3, %v2416_v1  ;;  %v2419_v5 = vpop.f32.mrb[6].mxu0  ;;  %v2480_v6 = vpop.f32.mrb[4].mxu1 }
 0x165   : > { %v2420_v7 = vpop.f32.mrb[7].mxu0  ;;  %v2481_v10 = vpop.f32.mrb[5].mxu1 }
 0x166   : > { %v978_v8 = vadd.f32 %v2418_v4, %v3545_v50  ;;  %v2421_v9 = vadd.f32 %v2420_v7, %v2419_v5  ;;  %v2482_v11 = vadd.f32 %v2481_v10, %v2480_v6  ;;  %v2483_v12 = vpop.f32.mrb[6].mxu1  ;;  %v1768_v6 = vld [vmem:[%s3580_s27 + $0x10] sm:$0xff]  ;;  %v1766_v7 = vld [vmem:[%s3580_s27] sm:$0xff] }
 0x167   : > { %v2484_v14 = vpop.f32.mrb[7].mxu1  ;;  %1783 = vperm.xlu0 %2850, %v1766_v7   ;;  %1789 = vperm.xlu1 %2851, %v1768_v6  }
 0x168   : > { %v981_v13 = vadd.f32 %v2421_v9, %v3545_v50  ;;  %v3555_v15 = vadd.f32 %v2482_v11, %v978_v8  ;;  %v2485_v16 = vadd.f32 %v2484_v14, %v2483_v12  ;;  %v1775_v11 = vld [vmem:[%s3580_s27 + $0x48] sm:$0xff] }
 0x16a   : > { %v2422_v17 = vpop.f32.mrb[8].mxu0  ;;  %v3557_v18 = vadd.f32 %v2485_v16, %v981_v13 }
 0x16b   : > { %v2423_v19 = vpop.f32.mrb[9].mxu0  ;;  %1810 = vperm.xlu0 %2850, %v1775_v11  }
 0x16c   : > { %v2424_v20 = vadd.f32 %v2423_v19, %v2422_v17  ;;  %v2425_v21 = vpop.f32.mrb[10].mxu0  ;;  %v2486_v22 = vpop.f32.mrb[8].mxu1  ;;  %v1769_v17 = vld [vmem:[%s3580_s27 + $0x18] sm:$0xff] }
 0x16d   : > { %v2426_v23 = vpop.f32.mrb[11].mxu0  ;;  %v2487_v26 = vpop.f32.mrb[9].mxu1  ;;  %1792 = vperm.xlu1 %2851, %v1769_v17  }
 0x16e   : > { %v986_v24 = vadd.f32 %v2424_v20, %v3545_v50  ;;  %v2427_v25 = vadd.f32 %v2426_v23, %v2425_v21  ;;  %v2488_v27 = vadd.f32 %v2487_v26, %v2486_v22  ;;  %v2489_v28 = vpop.f32.mrb[10].mxu1 }
 0x16f   : > { %v2490_v30 = vpop.f32.mrb[11].mxu1 }
 0x170   : > { %v989_v29 = vadd.f32 %v2427_v25, %v3545_v50  ;;  %v3561_v31 = vadd.f32 %v2488_v27, %v986_v24  ;;  %v2491_v32 = vadd.f32 %v2490_v30, %v2489_v28  ;;  %v1777_v24 = vld [vmem:[%s3580_s27 + $0x58] sm:$0xff] }
 0x171   : > { %1816 = vperm.xlu0 %2850, %v1777_v24  }
 0x172   : > { %v2428_v33 = vpop.f32.mrb[12].mxu0  ;;  %v3563_v34 = vadd.f32 %v2491_v32, %v989_v29  ;;  %v1770_v29 = vld [vmem:[%s3580_s27 + $0x20] sm:$0xff] }
 0x173   : > { %v2429_v35 = vpop.f32.mrb[13].mxu0  ;;  %1795 = vperm.xlu1 %2851, %v1770_v29  }
 0x174   : > { %v2430_v36 = vadd.f32 %v2429_v35, %v2428_v33  ;;  %v2431_v37 = vpop.f32.mrb[14].mxu0  ;;  %v2492_v38 = vpop.f32.mrb[12].mxu1 }
 0x175   : > { %v2432_v39 = vpop.f32.mrb[15].mxu0  ;;  %v2493_v42 = vpop.f32.mrb[13].mxu1 }
 0x176   : > { %v994_v40 = vadd.f32 %v2430_v36, %v3545_v50  ;;  %v2433_v41 = vadd.f32 %v2432_v39, %v2431_v37  ;;  %v2494_v43 = vadd.f32 %v2493_v42, %v2492_v38  ;;  %v2495_v44 = vpop.f32.mrb[14].mxu1  ;;  %v1771_v39 = vld [vmem:[%s3580_s27 + $0x28] sm:$0xff] }
 0x177   : > { %v2496_v46 = vpop.f32.mrb[15].mxu1  ;;  %1798 = vperm.xlu1 %2851, %v1771_v39  }
 0x178   : > { %v997_v45 = vadd.f32 %v2433_v41, %v3545_v50  ;;  %v3570_v47 = vadd.f32 %v2494_v43, %v994_v40  ;;  %v2497_v48 = vadd.f32 %v2496_v46, %v2495_v44 }
 0x17a   : > { %v2434_v51 = vpop.f32.mrb[16].mxu0  ;;  %v3573_v52 = vadd.f32 %v2497_v48, %v997_v45 }
 0x17b   : > { %v2435_v53 = vpop.f32.mrb[17].mxu0 }
 0x17c   : > { %v2436_v54 = vadd.f32 %v2435_v53, %v2434_v51  ;;  %v2437_v55 = vpop.f32.mrb[18].mxu0  ;;  %v2498_v56 = vpop.f32.mrb[16].mxu1  ;;  %v1772_v51 = vld [vmem:[%s3580_s27 + $0x30] sm:$0xff] }
 0x17d   : > { %v2438_v57 = vpop.f32.mrb[19].mxu0  ;;  %v2499_v60 = vpop.f32.mrb[17].mxu1  ;;  %1801 = vperm.xlu1 %2851, %v1772_v51  }
 0x17e   : > { %v1002_v58 = vadd.f32 %v2436_v54, %v3545_v50  ;;  %v2439_v59 = vadd.f32 %v2438_v57, %v2437_v55  ;;  %v2500_v61 = vadd.f32 %v2499_v60, %v2498_v56  ;;  %v2501_v62 = vpop.f32.mrb[18].mxu1  ;;  %v1773_v60 = vld [vmem:[%s3580_s27 + $0x38] sm:$0xff] }
 0x17f   : > { %v2502_v3 = vpop.f32.mrb[19].mxu1 }
 0x180   : > { %v1005_v1 = vadd.f32 %v2439_v59, %v3545_v50  ;;  %v3584_v4 = vadd.f32 %v2500_v61, %v1002_v58  ;;  %v2503_v5 = vadd.f32 %v2502_v3, %v2501_v62 }
 0x181   : > { %1804 = vperm.xlu1 %2851, %v1773_v60  }
 0x182   : > { %v2440_v8 = vpop.f32.mrb[20].mxu0  ;;  %v3588_v9 = vadd.f32 %v2503_v5, %v1005_v1 }
 0x183   : > { %v2441_v10 = vpop.f32.mrb[21].mxu0 }
 0x184   : > { %v2442_v12 = vadd.f32 %v2441_v10, %v2440_v8  ;;  %v2443_v13 = vpop.f32.mrb[22].mxu0  ;;  %v2504_v14 = vpop.f32.mrb[20].mxu1  ;;  %v1774_v10 = vld [vmem:[%s3580_s27 + $0x40] sm:$0xff] }
 0x185   : > { %v2444_v16 = vpop.f32.mrb[23].mxu0  ;;  %v2505_v21 = vpop.f32.mrb[21].mxu1  ;;  %1807 = vperm.xlu1 %2851, %v1774_v10  }
 0x186   : > { %v1010_v19 = vadd.f32 %v2442_v12, %v3545_v50  ;;  %v2445_v20 = vadd.f32 %v2444_v16, %v2443_v13  ;;  %v2506_v22 = vadd.f32 %v2505_v21, %v2504_v14  ;;  %v2507_v23 = vpop.f32.mrb[22].mxu1 }
 0x187   : > { %v2508_v26 = vpop.f32.mrb[23].mxu1 }
 0x188   : > { %v1013_v25 = vadd.f32 %v2445_v20, %v3545_v50  ;;  %v3595_v27 = vadd.f32 %v2506_v22, %v1010_v19  ;;  %v2509_v28 = vadd.f32 %v2508_v26, %v2507_v23  ;;  %v1776_v20 = vld [vmem:[%s3580_s27 + $0x50] sm:$0xff] }
 0x189   : > { %1813 = vperm.xlu1 %2851, %v1776_v20  }
 0x18a   : > { %v2446_v30 = vpop.f32.mrb[24].mxu0  ;;  %v3598_v32 = vadd.f32 %v2509_v28, %v1013_v25 }
 0x18b   : > { %v2447_v33 = vpop.f32.mrb[25].mxu0 }
 0x18c   : > { %v2448_v35 = vadd.f32 %v2447_v33, %v2446_v30  ;;  %v2449_v36 = vpop.f32.mrb[26].mxu0  ;;  %v2510_v37 = vpop.f32.mrb[24].mxu1 }
 0x18d   : > { %v2450_v38 = vpop.f32.mrb[27].mxu0  ;;  %v2511_v42 = vpop.f32.mrb[25].mxu1 }
 0x18e   : > { %v1018_v40 = vadd.f32 %v2448_v35, %v3545_v50  ;;  %v2451_v41 = vadd.f32 %v2450_v38, %v2449_v36  ;;  %v2512_v43 = vadd.f32 %v2511_v42, %v2510_v37  ;;  %v2513_v44 = vpop.f32.mrb[26].mxu1 }
 0x18f   : > { %v2514_v46 = vpop.f32.mrb[27].mxu1 }
 0x190   : > { %v1021_v45 = vadd.f32 %v2451_v41, %v3545_v50  ;;  %v3603_v48 = vadd.f32 %v2512_v43, %v1018_v40  ;;  %v2515_v49 = vadd.f32 %v2514_v46, %v2513_v44 }
 0x192   : > { %v2452_v53 = vpop.f32.mrb[28].mxu0  ;;  %v3606_v54 = vadd.f32 %v2515_v49, %v1021_v45 }
 0x193   : > { %v2453_v55 = vpop.f32.mrb[29].mxu0 }
 0x194   : > { %v2454_v56 = vadd.f32 %v2453_v55, %v2452_v53  ;;  %v2455_v57 = vpop.f32.mrb[30].mxu0  ;;  %v2516_v58 = vpop.f32.mrb[28].mxu1 }
 0x195   : > { %v2456_v59 = vpop.f32.mrb[31].mxu0  ;;  %v2517_v0 = vpop.f32.mrb[29].mxu1 }
 0x196   : > { %v1026_v61 = vadd.f32 %v2454_v56, %v3545_v50  ;;  %v2457_v62 = vadd.f32 %v2456_v59, %v2455_v57  ;;  %v2518_v1 = vadd.f32 %v2517_v0, %v2516_v58  ;;  %v2519_v3 = vpop.f32.mrb[30].mxu1 }
 0x197   : > { %v2520_v6 = vpop.f32.mrb[31].mxu1 }
 0x198   : > { %v1029_v5 = vadd.f32 %v2457_v62, %v3545_v50  ;;  %v3611_v7 = vadd.f32 %v2518_v1, %v1026_v61  ;;  %v2521_v8 = vadd.f32 %v2520_v6, %v2519_v3 }
 0x19a   : > { %v2538_v11 = vpop.f32.mrb[32].mxu0  ;;  %v3614_v12 = vadd.f32 %v2521_v8, %v1029_v5 }
 0x19b   : > { %v2539_v13 = vpop.f32.mrb[33].mxu0 }
 0x19c   : > { %v2540_v14 = vadd.f32 %v2539_v13, %v2538_v11  ;;  %v2541_v16 = vpop.f32.mrb[34].mxu0  ;;  %v2631_v19 = vpop.f32.mrb[32].mxu1 }
 0x19d   : > { %v2542_v17 = vpop.f32.mrb[35].mxu0  ;;  %v1260_v50 = vpop.f32.mrb[33].mxu1 }
 0x19e   : > { %v2543_v21 = vadd.f32 %v2542_v17, %v2541_v16  ;;  %v1164_v22 = vadd.f32 %v2540_v14, %v3549_v63  ;;  %v2632_v23 = vpop.f32.mrb[34].mxu1 }
 0x19f   : > { %v1263_v26 = vpop.f32.mrb[35].mxu1 }
 0x1a0   : > { %v1261_v24 = vadd.f32 %v1260_v50, %v1164_v22  ;;  %v1167_v25 = vadd.f32 %v2543_v21, %v3551_v2 }
 0x1a2   : > { %v1323_v28 = vsub.f32 0.0, %v1261_v24  ;;  %v1264_v29 = vadd.f32 %v1263_v26, %v1167_v25  ;;  %v2544_v30 = vpop.f32.mrb[36].mxu0 }
 0x1a3   : > { %v2545_v33 = vpop.f32.mrb[37].mxu0 }
 0x1a4   : > { %v1339_v35 = vmul.f32 1.442695, %v1323_v28  ;;  %v1324_v36 = vsub.f32 0.0, %v1264_v29  ;;  %v2546_v37 = vadd.f32 %v2545_v33, %v2544_v30  ;;  %v2547_v38 = vpop.f32.mrb[38].mxu0  ;;  %v2635_v40 = vpop.f32.mrb[36].mxu1 }
 0x1a5   : > { %v2548_v39 = vpop.f32.mrb[39].mxu0  ;;  %v1276_v43 = vpop.f32.mrb[37].mxu1 }
 0x1a6   : > { %2901 = vpow2.f32 %v1339_v35  ;;  %v1341_v41 = vmul.f32 1.442695, %v1324_v36  ;;  %v1172_v63 = vadd.f32 %v2546_v37, %v3555_v15  ;;  %v2549_v42 = vadd.f32 %v2548_v39, %v2547_v38  ;;  %v2636_v44 = vpop.f32.mrb[38].mxu1 }
 0x1a7   : > { %v1279_v46 = vpop.f32.mrb[39].mxu1 }
 0x1a8   : > { %2903 = vpow2.f32 %v1341_v41  ;;  %v1269_v2 = vadd.f32 %v2631_v19, %v1172_v63  ;;  %v1175_v45 = vadd.f32 %v2549_v42, %v3557_v18 }
 0x1aa   : > { %v1325_v49 = vsub.f32 0.0, %v1269_v2  ;;  %v1272_v51 = vadd.f32 %v2632_v23, %v1175_v45  ;;  %v2550_v53 = vpop.f32.mrb[40].mxu0 }
 0x1ab   : > { %v2551_v55 = vpop.f32.mrb[41].mxu0 }
 0x1ac   : > { %v1343_v56 = vmul.f32 1.442695, %v1325_v49  ;;  %v1326_v57 = vsub.f32 0.0, %v1272_v51  ;;  %v2552_v58 = vadd.f32 %v2551_v55, %v2550_v53  ;;  %v2553_v59 = vpop.f32.mrb[42].mxu0  ;;  %v3621_v61 = vpop.f32.mrb[40].mxu1 }
 0x1ad   : > { %v2554_v60 = vpop.f32.mrb[43].mxu0  ;;  %v1292_v1 = vpop.f32.mrb[41].mxu1 }
 0x1ae   : > { %2905 = vpow2.f32 %v1343_v56  ;;  %v1345_v15 = vmul.f32 1.442695, %v1326_v57  ;;  %v2555_v62 = vadd.f32 %v2554_v60, %v2553_v59  ;;  %v1180_v0 = vadd.f32 %v2552_v58, %v3561_v31  ;;  %v3624_v3 = vpop.f32.mrb[42].mxu1 }
 0x1af   : > { %v1295_v8 = vpop.f32.mrb[43].mxu1 }
 0x1b0   : > { %v2902_v18 = vpop.eup %2901  ;;  %2907 = vpow2.f32 %v1345_v15  ;;  %v1277_v5 = vadd.f32 %v1276_v43, %v1180_v0  ;;  %v1183_v6 = vadd.f32 %v2555_v62, %v3563_v34 }
 0x1b1   : > { %v1371_v10 = vadd.f32 1.0, %v2902_v18 }
 0x1b2   : > { %v2904_v11 = vpop.eup %2903  ;;  %v1327_v13 = vsub.f32 0.0, %v1277_v5  ;;  %v1280_v14 = vadd.f32 %v1279_v46, %v1183_v6  ;;  %v2556_v16 = vpop.f32.mrb[44].mxu0 }
 0x1b3   : > { %2909 = vrcp.f32 %v1371_v10  ;;  %v1372_v17 = vadd.f32 1.0, %v2904_v11  ;;  %v2557_v19 = vpop.f32.mrb[45].mxu0 }
 0x1b4   : > { %v1347_v20 = vmul.f32 1.442695, %v1327_v13  ;;  %v1328_v21 = vsub.f32 0.0, %v1280_v14  ;;  %v2558_v31 = vadd.f32 %v2557_v19, %v2556_v16  ;;  %v2559_v22 = vpop.f32.mrb[46].mxu0  ;;  %v3627_v23 = vpop.f32.mrb[44].mxu1 }
 0x1b5   : > { %2911 = vrcp.f32 %v1372_v17  ;;  %v2560_v50 = vpop.f32.mrb[47].mxu0  ;;  %v3630_v26 = vpop.f32.mrb[45].mxu1 }
 0x1b6   : > { %2913 = vpow2.f32 %v1347_v20  ;;  %v1349_v24 = vmul.f32 1.442695, %v1328_v21  ;;  %v1188_v34 = vadd.f32 %v2558_v31, %v3570_v47  ;;  %v2561_v25 = vadd.f32 %v2560_v50, %v2559_v22  ;;  %v3632_v28 = vpop.f32.mrb[46].mxu1 }
 0x1b7   : > { %v3635_v35 = vpop.f32.mrb[47].mxu1 }
 0x1b8   : > { %v2906_v29 = vpop.eup %2905  ;;  %2915 = vpow2.f32 %v1349_v24  ;;  %v1285_v30 = vadd.f32 %v2635_v40, %v1188_v34  ;;  %v1191_v33 = vadd.f32 %v2561_v25, %v3573_v52 }
 0x1b9   : > { %v1373_v36 = vadd.f32 1.0, %v2906_v29 }
 0x1ba   : > { %v2908_v37 = vpop.eup %2907  ;;  %v1329_v38 = vsub.f32 0.0, %v1285_v30  ;;  %v1288_v39 = vadd.f32 %v2636_v44, %v1191_v33  ;;  %v2562_v41 = vpop.f32.mrb[48].mxu0 }
 0x1bb   : > { %2917 = vrcp.f32 %v1373_v36  ;;  %v1374_v63 = vadd.f32 1.0, %v2908_v37  ;;  %v2563_v47 = vpop.f32.mrb[49].mxu0 }
 0x1bc   : > { %v1351_v42 = vmul.f32 1.442695, %v1329_v38  ;;  %v1330_v43 = vsub.f32 0.0, %v1288_v39  ;;  %v2564_v2 = vadd.f32 %v2563_v47, %v2562_v41  ;;  %v2565_v45 = vpop.f32.mrb[50].mxu0 }
 0x1bd   : > { %v2910_v46 = vpop.eup %2909  ;;  %2919 = vrcp.f32 %v1374_v63  ;;  %v2566_v49 = vpop.f32.mrb[51].mxu0 }
 0x1be   : > { %2921 = vpow2.f32 %v1351_v42  ;;  %v1353_v40 = vmul.f32 1.442695, %v1330_v43  ;;  %v2567_v52 = vadd.f32 %v2566_v49, %v2565_v45  ;;  %2677 = vmatprep.mubr.f32.mxu1 %v2910_v46  ;;  %v1196_v51 = vadd.f32 %v2564_v2, %v3584_v4 }
 0x1bf   : > { %v2912_v53 = vpop.eup %2911 }
 0x1c0   : > { %v2914_v55 = vpop.eup %2913  ;;  %2923 = vpow2.f32 %v1353_v40  ;;  %v1293_v44 = vadd.f32 %v1292_v1, %v1196_v51  ;;  %2678 = vmatmul.mubr.f32.vlgmr.msra.gmra.mrb[48].mxu1 %v2912_v53  ;;  %v1199_v56 = vadd.f32 %v2567_v52, %v3588_v9 }
 0x1c1   : > { %v1375_v57 = vadd.f32 1.0, %v2914_v55 }
 0x1c2   : > { %v2916_v58 = vpop.eup %2915  ;;  %v1331_v59 = vsub.f32 0.0, %v1293_v44  ;;  %v1296_v60 = vadd.f32 %v1295_v8, %v1199_v56  ;;  %v2568_v15 = vpop.f32.mrb[52].mxu0 }
 0x1c3   : > { %2925 = vrcp.f32 %v1375_v57  ;;  %v1376_v62 = vadd.f32 1.0, %v2916_v58  ;;  %v2569_v0 = vpop.f32.mrb[53].mxu0 }
 0x1c4   : > { %v1355_v18 = vmul.f32 1.442695, %v1331_v59  ;;  %v1332_v5 = vsub.f32 0.0, %v1296_v60  ;;  %v2570_v6 = vadd.f32 %v2569_v0, %v2568_v15  ;;  %v2571_v10 = vpop.f32.mrb[54].mxu0 }
 0x1c5   : > { %v2918_v4 = vpop.eup %2917  ;;  %2927 = vrcp.f32 %v1376_v62  ;;  %v2572_v11 = vpop.f32.mrb[55].mxu0 }
 0x1c6   : > { %2929 = vpow2.f32 %v1355_v18  ;;  %v1357_v1 = vmul.f32 1.442695, %v1332_v5  ;;  %v1204_v13 = vadd.f32 %v2570_v6, %v3595_v27  ;;  %v2573_v9 = vadd.f32 %v2572_v11, %v2571_v10  ;;  %2680 = vmatprep.mubr.f32.mxu1 %v2918_v4 }
 0x1c7   : > { %v2920_v14 = vpop.eup %2919 }
 0x1c8   : > { %v2922_v16 = vpop.eup %2921  ;;  %2931 = vpow2.f32 %v1357_v1  ;;  %v1301_v8 = vadd.f32 %v3621_v61, %v1204_v13  ;;  %v1207_v17 = vadd.f32 %v2573_v9, %v3598_v32  ;;  %2681 = vmatmul.mubr.f32.gmra.mrb[50].mxu1 %v2920_v14 }
 0x1c9   : > { %v1377_v19 = vadd.f32 1.0, %v2922_v16 }
 0x1ca   : > { %v2924_v20 = vpop.eup %2923  ;;  %v1333_v21 = vsub.f32 0.0, %v1301_v8  ;;  %v1304_v31 = vadd.f32 %v3624_v3, %v1207_v17  ;;  %v2574_v22 = vpop.f32.mrb[56].mxu0 }
 0x1cb   : > { %2933 = vrcp.f32 %v1377_v19  ;;  %v1378_v50 = vadd.f32 1.0, %v2924_v20  ;;  %v2575_v24 = vpop.f32.mrb[57].mxu0  ;;  %v2357_v19 = vld [vmem:[%s4052_s4] ss:$0 sm:$0xff] }
 0x1cc   : > { %v1359_v27 = vmul.f32 1.442695, %v1333_v21  ;;  %v1334_v34 = vsub.f32 0.0, %v1304_v31  ;;  %v2576_v25 = vadd.f32 %v2575_v24, %v2574_v22  ;;  %v2577_v29 = vpop.f32.mrb[58].mxu0 }
 0x1cd   : > { %v2926_v30 = vpop.eup %2925  ;;  %2935 = vrcp.f32 %v1378_v50  ;;  %v2578_v33 = vpop.f32.mrb[59].mxu0 }
 0x1ce   : > { %2937 = vpow2.f32 %v1359_v27  ;;  %v1361_v61 = vmul.f32 1.442695, %v1334_v34  ;;  %v2579_v32 = vadd.f32 %v2578_v33, %v2577_v29  ;;  %2683 = vmatprep.mubr.f32.mxu1 %v2926_v30  ;;  %v1212_v36 = vadd.f32 %v2576_v25, %v3603_v48 }
 0x1cf   : > { %v2928_v37 = vpop.eup %2927 }
 0x1d0   : > { %v2930_v38 = vpop.eup %2929  ;;  %2939 = vpow2.f32 %v1361_v61  ;;  %v1309_v3 = vadd.f32 %v3630_v26, %v1212_v36  ;;  %2684 = vmatmul.mubr.f32.gmra.mrb[52].mxu1 %v2928_v37  ;;  %v1215_v39 = vadd.f32 %v2579_v32, %v3606_v54 }
 0x1d1   : > { %v1379_v41 = vadd.f32 1.0, %v2930_v38 }
 0x1d2   : > { %v2932_v63 = vpop.eup %2931  ;;  %v1335_v47 = vsub.f32 0.0, %v1309_v3  ;;  %v1312_v42 = vadd.f32 %v3635_v35, %v1215_v39  ;;  %v2580_v43 = vpop.f32.mrb[60].mxu0 }
 0x1d3   : > { %2941 = vrcp.f32 %v1379_v41  ;;  %v1380_v2 = vadd.f32 1.0, %v2932_v63  ;;  %v2581_v45 = vpop.f32.mrb[61].mxu0 }
 0x1d4   : > { %v1363_v46 = vmul.f32 1.442695, %v1335_v47  ;;  %v1336_v49 = vsub.f32 0.0, %v1312_v42  ;;  %v2582_v48 = vadd.f32 %v2581_v45, %v2580_v43  ;;  %v2583_v40 = vpop.f32.mrb[62].mxu0 }
 0x1d5   : > { %v2934_v52 = vpop.eup %2933  ;;  %2943 = vrcp.f32 %v1380_v2  ;;  %v2584_v51 = vpop.f32.mrb[63].mxu0 }
 0x1d6   : > { %2945 = vpow2.f32 %v1363_v46  ;;  %v1365_v26 = vmul.f32 1.442695, %v1336_v49  ;;  %v1220_v54 = vadd.f32 %v2582_v48, %v3611_v7  ;;  %v2585_v53 = vadd.f32 %v2584_v51, %v2583_v40  ;;  %2686 = vmatprep.mubr.f32.mxu1 %v2934_v52 }
 0x1d7   : > { %v2936_v55 = vpop.eup %2935 }
 0x1d8   : > { %v2938_v44 = vpop.eup %2937  ;;  %2947 = vpow2.f32 %v1365_v26  ;;  %v1317_v35 = vadd.f32 %v3627_v23, %v1220_v54  ;;  %v1223_v56 = vadd.f32 %v2585_v53, %v3614_v12  ;;  %2687 = vmatmul.mubr.f32.gmra.mrb[54].mxu1 %v2936_v55 }
 0x1d9   : > { %v1381_v57 = vadd.f32 1.0, %v2938_v44 }
 0x1da   : > { %v2940_v58 = vpop.eup %2939  ;;  %v1337_v59 = vsub.f32 0.0, %v1317_v35  ;;  %v1320_v60 = vadd.f32 %v3632_v28, %v1223_v56 }
 0x1db   : > { %2949 = vrcp.f32 %v1381_v57  ;;  %v1382_v15 = vadd.f32 1.0, %v2940_v58 }
 0x1dc   : > { %v1367_v62 = vmul.f32 1.442695, %v1337_v59  ;;  %v1338_v0 = vsub.f32 0.0, %v1320_v60 }
 0x1dd   : > { %v2942_v7 = vpop.eup %2941  ;;  %2951 = vrcp.f32 %v1382_v15 }
 0x1de   : > { %2953 = vpow2.f32 %v1367_v62  ;;  %v1369_v18 = vmul.f32 1.442695, %v1338_v0  ;;  %2689 = vmatprep.mubr.f32.mxu1 %v2942_v7 }
 0x1df   : > { %v2944_v5 = vpop.eup %2943 }
 0x1e0   : > { %v2946_v6 = vpop.eup %2945  ;;  %2955 = vpow2.f32 %v1369_v18  ;;  %2690 = vmatmul.mubr.f32.gmra.mrb[56].mxu1 %v2944_v5  ;;  %v1778_v5 = vld [vmem:[%s3580_s27 + $0x60] sm:$0xff] }
 0x1e1   : > { %v1383_v12 = vadd.f32 1.0, %v2946_v6  ;;  %v1779_v6 = vld [vmem:[%s3580_s27 + $0x68] sm:$0xff] }
 0x1e2   : > { %v2948_v23 = vpop.eup %2947 }
 0x1e3   : > { %2957 = vrcp.f32 %v1383_v12  ;;  %v1384_v10 = vadd.f32 1.0, %v2948_v23  ;;  %v3720_v12 = vpop.permute.xlu1 %1786 }
 0x1e5   : > { %v2950_v4 = vpop.eup %2949  ;;  %2959 = vrcp.f32 %v1384_v10 }
 0x1e6   : > { %2692 = vmatprep.mubr.f32.mxu1 %v2950_v4 }
 0x1e7   : > { %v2952_v28 = vpop.eup %2951  ;;  %v3722_v23 = vpop.permute.xlu1 %1789 }
 0x1e8   : > { %v2954_v11 = vpop.eup %2953  ;;  %2693 = vmatmul.mubr.f32.gmra.mrb[58].mxu1 %v2952_v28 }
 0x1e9   : > { %v1385_v1 = vadd.f32 1.0, %v2954_v11  ;;  %v3730_v11 = vpop.permute.xlu0 %1783 }
 0x1ea   : > { %v2956_v13 = vpop.eup %2955 }
 0x1eb   : > { %2961 = vrcp.f32 %v1385_v1  ;;  %v1386_v9 = vadd.f32 1.0, %v2956_v13 }
 0x1ec   : > { %v3724_v10 = vpop.permute.xlu1 %1792 }
 0x1ed   : > { %v2958_v14 = vpop.eup %2957  ;;  %2963 = vrcp.f32 %v1386_v9  ;;  %v3734_v13 = vpop.permute.xlu0 %1810 }
 0x1ee   : > { %2695 = vmatprep.mubr.f32.mxu1 %v2958_v14 }
 0x1ef   : > { %v2960_v16 = vpop.eup %2959 }
 0x1f0   : > { %2696 = vmatmul.mubr.f32.gmra.mrb[60].mxu1 %v2960_v16 }
 0x1f1   : > { %v3738_v14 = vpop.permute.xlu0 %1816 }
 0x1f2   : > { %v3726_v4 = vpop.permute.xlu1 %1795 }
 0x1f5   : > { %v2962_v8 = vpop.eup %2961 }
 0x1f6   : > { %2698 = vmatprep.mubr.f32.mxu1 %v2962_v8  ;;  %v3728_v28 = vpop.permute.xlu1 %1798 }
 0x1f7   : > { %v2964_v17 = vpop.eup %2963 }
 0x1f8   : > { %2699 = vmatmul.mubr.f32.gmra.mrb[62].mxu1 %v2964_v17 }
 0x1fc   : > { %v3732_v1 = vpop.permute.xlu1 %1801 }
 0x200   : > { %v3736_v9 = vpop.permute.xlu1 %1804 }
 0x204   : > { %v3740_v16 = vpop.permute.xlu1 %1807 }
 0x293   : > { %v2679_v20 = vpop.f32.mrb[48].mxu1 }
 0x294   : > { %v3654_v21 = vadd.f32 %v2679_v20, %v2357_v19  ;;  %v1492_v31 = vpop.f32.mrb[49].mxu1  ;;  %v3746_v20 = vpop.permute.xlu1 %1813 }
 0x295   : > { %v3656_v22 = vadd.f32 %v2357_v19, %v1492_v31 }
 0x296   : > { %v1575_v50 = vsel %vm1571_vm1, %v3654_v21, -inf }
 0x297   : > { %1576 = vmax.xlane.f32.xlu0 %v1575_v50  ;;  %v1572_v24 = vsel %vm1571_vm1, %v3656_v22, -inf }
 0x29b   : > { %v2682_v27 = vpop.f32.mrb[50].mxu1  ;;  %1573 = vmax.xlane.f32.xlu0 %v1572_v24 }
 0x29c   : > { %v3662_v34 = vadd.f32 %v2682_v27, %v2357_v19  ;;  %v1502_v25 = vpop.f32.mrb[51].mxu1 }
 0x29d   : > { %v3664_v29 = vadd.f32 %v2357_v19, %v1502_v25 }
 0x29e   : > { %v1581_v30 = vsel %vm1571_vm1, %v3662_v34, -inf }
 0x29f   : > { %1582 = vmax.xlane.f32.xlu1 %v1581_v30  ;;  %v1578_v33 = vsel %vm1571_vm1, %v3664_v29, -inf }
 0x2a3   : > { %v2685_v61 = vpop.f32.mrb[52].mxu1  ;;  %1579 = vmax.xlane.f32.xlu1 %v1578_v33 }
 0x2a4   : > { %v3670_v32 = vadd.f32 %v2685_v61, %v2357_v19  ;;  %v1512_v36 = vpop.f32.mrb[53].mxu1 }
 0x2a5   : > { %v3672_v37 = vadd.f32 %v2357_v19, %v1512_v36 }
 0x2a6   : > { %v1587_v38 = vsel %vm1571_vm1, %v3670_v32, -inf }
 0x2a7   : > { %1588 = vmax.xlane.f32.xlu1 %v1587_v38  ;;  %v1584_v3 = vsel %vm1571_vm1, %v3672_v37, -inf }
 0x2a8   : > { %1585 = vmax.xlane.f32.xlu0 %v1584_v3 }
 0x2ab   : > { %v2688_v39 = vpop.f32.mrb[54].mxu1 }
 0x2ac   : > { %v3678_v41 = vadd.f32 %v2688_v39, %v2357_v19  ;;  %v1522_v63 = vpop.f32.mrb[55].mxu1 }
 0x2ad   : > { %v3680_v47 = vadd.f32 %v2357_v19, %v1522_v63 }
 0x2ae   : > { %v1593_v42 = vsel %vm1571_vm1, %v3678_v41, -inf }
 0x2af   : > { %1594 = vmax.xlane.f32.xlu1 %v1593_v42  ;;  %v1590_v43 = vsel %vm1571_vm1, %v3680_v47, -inf }
 0x2b0   : > { %1591 = vmax.xlane.f32.xlu0 %v1590_v43 }
 0x2b3   : > { %v2691_v2 = vpop.f32.mrb[56].mxu1 }
 0x2b4   : > { %v3686_v45 = vadd.f32 %v2691_v2, %v2357_v19  ;;  %v1532_v46 = vpop.f32.mrb[57].mxu1 }
 0x2b5   : > { %v3688_v49 = vadd.f32 %v2357_v19, %v1532_v46 }
 0x2b6   : > { %v1599_v48 = vsel %vm1571_vm1, %v3686_v45, -inf }
 0x2b7   : > { %1600 = vmax.xlane.f32.xlu1 %v1599_v48  ;;  %v1596_v40 = vsel %vm1571_vm1, %v3688_v49, -inf }
 0x2b8   : > { %1597 = vmax.xlane.f32.xlu0 %v1596_v40 }
 0x2bb   : > { %v2694_v52 = vpop.f32.mrb[58].mxu1 }
 0x2bc   : > { %v3694_v51 = vadd.f32 %v2694_v52, %v2357_v19  ;;  %v1542_v26 = vpop.f32.mrb[59].mxu1 }
 0x2bd   : > { %v3696_v54 = vadd.f32 %v2357_v19, %v1542_v26 }
 0x2be   : > { %v1605_v53 = vsel %vm1571_vm1, %v3694_v51, -inf }
 0x2bf   : > { %1606 = vmax.xlane.f32.xlu1 %v1605_v53  ;;  %v1602_v55 = vsel %vm1571_vm1, %v3696_v54, -inf }
 0x2c0   : > { %1603 = vmax.xlane.f32.xlu0 %v1602_v55 }
 0x2c3   : > { %v2697_v44 = vpop.f32.mrb[60].mxu1 }
 0x2c4   : > { %v3702_v35 = vadd.f32 %v2697_v44, %v2357_v19  ;;  %v1552_v56 = vpop.f32.mrb[61].mxu1 }
 0x2c5   : > { %v3704_v57 = vadd.f32 %v2357_v19, %v1552_v56 }
 0x2c6   : > { %v1611_v58 = vsel %vm1571_vm1, %v3702_v35, -inf }
 0x2c7   : > { %1612 = vmax.xlane.f32.xlu1 %v1611_v58  ;;  %v1608_v59 = vsel %vm1571_vm1, %v3704_v57, -inf }
 0x2c8   : > { %1609 = vmax.xlane.f32.xlu0 %v1608_v59 }
 0x2cb   : > { %v2700_v60 = vpop.f32.mrb[62].mxu1 }
 0x2cc   : > { %v3710_v15 = vadd.f32 %v2700_v60, %v2357_v19  ;;  %v1562_v62 = vpop.f32.mrb[63].mxu1 }
 0x2cd   : > { %v3712_v0 = vadd.f32 %v2357_v19, %v1562_v62 }
 0x2ce   : > { %v1617_v7 = vsel %vm1571_vm1, %v3710_v15, -inf }
 0x2cf   : > { %1618 = vmax.xlane.f32.xlu1 %v1617_v7  ;;  %v1614_v18 = vsel %vm1571_vm1, %v3712_v0, -inf }
 0x2d0   : > { %1615 = vmax.xlane.f32.xlu0 %v1614_v18 }
 0x2e0   : > { %1819 = vperm.xlu1 %2851, %v1778_v5  }
 0x2e6   : > { %1822 = vperm.xlu0 %2850, %v1779_v6  }
 0x324   : > { %v1577_v8 = vpop.xlane.xlu0 %1576 }
 0x325   : > { %v3743_v17 = vsub.f32 %v3654_v21, %v1577_v8 }
 0x327   : > { %v1638_v19 = vmul.f32 1.442695, %v3743_v17 }
 0x328   : > { %v1574_v31 = vpop.xlane.xlu0 %1573 }
 0x329   : > { %2965 = vpow2.f32 %v1638_v19  ;;  %v3749_v50 = vsub.f32 %v3656_v22, %v1574_v31 }
 0x32b   : > { %v1636_v24 = vmul.f32 1.442695, %v3749_v50 }
 0x32c   : > { %v1583_v27 = vpop.xlane.xlu1 %1582 }
 0x32d   : > { %2967 = vpow2.f32 %v1636_v24  ;;  %v3753_v25 = vsub.f32 %v3662_v34, %v1583_v27 }
 0x32f   : > { %v1642_v30 = vmul.f32 1.442695, %v3753_v25 }
 0x330   : > { %v1580_v21 = vpop.xlane.xlu1 %1579 }
 0x331   : > { %2969 = vpow2.f32 %v1642_v30  ;;  %v3757_v33 = vsub.f32 %v3664_v29, %v1580_v21 }
 0x333   : > { %v2966_v61 = vpop.eup %2965  ;;  %v1640_v36 = vmul.f32 1.442695, %v3757_v33 }
 0x334   : > { %v1589_v38 = vpop.xlane.xlu1 %1588  ;;  %v1671_v22 = vsel %vm1571_vm1, %v2966_v61, 0.0 }
 0x335   : > { %2971 = vpow2.f32 %v1640_v36  ;;  %v3762_v3 = vsub.f32 %v3670_v32, %v1589_v38  ;;  %1672 = vadd.xlane.f32.xlu1 %v1671_v22  ;;  %v1586_v34 = vpop.xlane.xlu0 %1585 }
 0x336   : > { %v3765_v39 = vsub.f32 %v3672_v37, %v1586_v34 }
 0x337   : > { %v2968_v63 = vpop.eup %2967  ;;  %v1646_v42 = vmul.f32 1.442695, %v3762_v3 }
 0x338   : > { %v1644_v29 = vmul.f32 1.442695, %v3765_v39  ;;  %v1668_v43 = vsel %vm1571_vm1, %v2968_v63, 0.0 }
 0x339   : > { %2973 = vpow2.f32 %v1646_v42  ;;  %1669 = vadd.xlane.f32.xlu0 %v1668_v43 }
 0x33a   : > { %2975 = vpow2.f32 %v1644_v29 }
 0x33b   : > { %v2970_v2 = vpop.eup %2969 }
 0x33c   : > { %v1595_v46 = vpop.xlane.xlu1 %1594  ;;  %v1677_v32 = vsel %vm1571_vm1, %v2970_v2, 0.0 }
 0x33d   : > { %v3772_v48 = vsub.f32 %v3678_v41, %v1595_v46  ;;  %1678 = vadd.xlane.f32.xlu1 %v1677_v32  ;;  %v1592_v37 = vpop.xlane.xlu0 %1591 }
 0x33e   : > { %v3775_v40 = vsub.f32 %v3680_v47, %v1592_v37 }
 0x33f   : > { %v2972_v52 = vpop.eup %2971  ;;  %v1650_v26 = vmul.f32 1.442695, %v3772_v48 }
 0x340   : > { %v1648_v53 = vmul.f32 1.442695, %v3775_v40  ;;  %v1674_v55 = vsel %vm1571_vm1, %v2972_v52, 0.0 }
 0x341   : > { %2977 = vpow2.f32 %v1650_v26  ;;  %1675 = vadd.xlane.f32.xlu0 %v1674_v55 }
 0x342   : > { %2979 = vpow2.f32 %v1648_v53 }
 0x343   : > { %v2974_v44 = vpop.eup %2973 }
 0x344   : > { %v2976_v56 = vpop.eup %2975  ;;  %v1601_v58 = vpop.xlane.xlu1 %1600  ;;  %v1683_v41 = vsel %vm1571_vm1, %v2974_v44, 0.0 }
 0x345   : > { %v3782_v59 = vsub.f32 %v3686_v45, %v1601_v58  ;;  %1684 = vadd.xlane.f32.xlu1 %v1683_v41  ;;  %v1598_v47 = vpop.xlane.xlu0 %1597  ;;  %v1680_v60 = vsel %vm1571_vm1, %v2976_v56, 0.0 }
 0x346   : > { %v3786_v62 = vsub.f32 %v3688_v49, %v1598_v47  ;;  %1681 = vadd.xlane.f32.xlu0 %v1680_v60  ;;  %v1780_v47 = vld [vmem:[%s3580_s27 + $0x70] sm:$0xff]  ;;  %v1781_v60 = vld [vmem:[%s3580_s27 + $0x78] sm:$0xff] }
 0x347   : > { %v1654_v7 = vmul.f32 1.442695, %v3782_v59 }
 0x348   : > { %v1652_v18 = vmul.f32 1.442695, %v3786_v62 }
 0x349   : > { %2981 = vpow2.f32 %v1654_v7 }
 0x34a   : > { %2983 = vpow2.f32 %v1652_v18 }
 0x34b   : > { %v2978_v5 = vpop.eup %2977 }
 0x34c   : > { %v2980_v6 = vpop.eup %2979  ;;  %v1607_v8 = vpop.xlane.xlu1 %1606  ;;  %v1689_v45 = vsel %vm1571_vm1, %v2978_v5, 0.0 }
 0x34d   : > { %v3792_v19 = vsub.f32 %v3694_v51, %v1607_v8  ;;  %1690 = vadd.xlane.f32.xlu1 %v1689_v45  ;;  %v1604_v31 = vpop.xlane.xlu0 %1603  ;;  %v1686_v49 = vsel %vm1571_vm1, %v2980_v6, 0.0  ;;  %v1764_v6 = vlaneseq }
 0x34e   : > { %v3796_v24 = vsub.f32 %v3696_v54, %v1604_v31  ;;  %1687 = vadd.xlane.f32.xlu0 %v1686_v49 }
 0x34f   : > { %v1658_v27 = vmul.f32 1.442695, %v3792_v19  ;;  %v3830_v45 = vand.u32 127, %v1764_v6 }
 0x350   : > { %v1656_v30 = vmul.f32 1.442695, %v3796_v24 }
 0x351   : > { %2985 = vpow2.f32 %v1658_v27  ;;  %vm1831_vm2 = vcmp.eq.s32.totalorder %v3830_v45, %v3720_v12  ;;  %vm1830_vm3 = vcmp.eq.s32.totalorder %v3830_v45, %v3730_v11  ;;  %vm1833_vm4 = vcmp.eq.s32.totalorder %v3830_v45, %v3724_v10 }
 0x352   : > { %2987 = vpow2.f32 %v1656_v30  ;;  %vm1832_vm5 = vcmp.eq.s32.totalorder %v3830_v45, %v3722_v23  ;;  %vm1835_vm6 = vcmp.eq.s32.totalorder %v3830_v45, %v3728_v28  ;;  %vm1834_vm7 = vcmp.eq.s32.totalorder %v3830_v45, %v3726_v4 }
 0x353   : > { %v2982_v21 = vpop.eup %2981  ;;  %vm1837_vm8 = vcmp.eq.s32.totalorder %v3830_v45, %v3736_v9  ;;  %vm1836_vm9 = vcmp.eq.s32.totalorder %v3830_v45, %v3732_v1  ;;  %vm1839_vm10 = vcmp.eq.s32.totalorder %v3830_v45, %v3734_v13  ;;  %vm1838_vm11 = vcmp.eq.s32.totalorder %v3830_v45, %v3740_v16 }
 0x354   : > { %v2984_v61 = vpop.eup %2983  ;;  %v1613_v36 = vpop.xlane.xlu1 %1612  ;;  %v1695_v51 = vsel %vm1571_vm1, %v2982_v21, 0.0  ;;  %vm1841_vm12 = vcmp.eq.s32.totalorder %v3830_v45, %v3738_v14  ;;  %vm1840_vm13 = vcmp.eq.s32.totalorder %v3830_v45, %v3746_v20 }
 0x355   : > { %v3802_v38 = vsub.f32 %v3702_v35, %v1613_v36  ;;  %1696 = vadd.xlane.f32.xlu1 %v1695_v51  ;;  %v1610_v22 = vpop.xlane.xlu0 %1609  ;;  %v1692_v54 = vsel %vm1571_vm1, %v2984_v61, 0.0  ;;  %v3196_v36 = vmov 0.0  }
 0x356   : > { %v3806_v34 = vsub.f32 %v3704_v57, %v1610_v22  ;;  %1693 = vadd.xlane.f32.xlu0 %v1692_v54  ;;  %v2359_v51 = vsel %vm1831_vm2, 1.0, %v3196_v36 }
 0x357   : > { %v1662_v63 = vmul.f32 1.442695, %v3802_v38 }
 0x358   : > { %v1660_v42 = vmul.f32 1.442695, %v3806_v34 }
 0x359   : > { %2989 = vpow2.f32 %v1662_v63 }
 0x35a   : > { %2991 = vpow2.f32 %v1660_v42 }
 0x35b   : > { %v2986_v29 = vpop.eup %2985 }
 0x35c   : > { %v2988_v43 = vpop.eup %2987  ;;  %v1619_v2 = vpop.xlane.xlu1 %1618  ;;  %v1701_v35 = vsel %vm1571_vm1, %v2986_v29, 0.0 }
 0x35d   : > { %v3812_v46 = vsub.f32 %v3710_v15, %v1619_v2  ;;  %1702 = vadd.xlane.f32.xlu1 %v1701_v35  ;;  %v1616_v32 = vpop.xlane.xlu0 %1615  ;;  %v1698_v57 = vsel %vm1571_vm1, %v2988_v43, 0.0 }
 0x35e   : > { %v3816_v37 = vsub.f32 %v3712_v0, %v1616_v32  ;;  %1699 = vadd.xlane.f32.xlu0 %v1698_v57 }
 0x35f   : > { %v1666_v52 = vmul.f32 1.442695, %v3812_v46 }
 0x360   : > { %v1664_v26 = vmul.f32 1.442695, %v3816_v37  ;;  %v3826_v7 = vpop.permute.xlu1 %1819 }
 0x361   : > { %2993 = vpow2.f32 %v1666_v52  ;;  %v2361_v52 = vsel %vm1833_vm4, 1.0, %v3196_v36  ;;  %vm1842_vm15 = vcmp.eq.s32.totalorder %v3830_v45, %v3826_v7 }
 0x362   : > { %2995 = vpow2.f32 %v1664_v26 }
 0x363   : > { %v2990_v53 = vpop.eup %2989 }
 0x364   : > { %v2992_v55 = vpop.eup %2991  ;;  %v1707_v15 = vsel %vm1571_vm1, %v2990_v53, 0.0 }
 0x365   : > { %1708 = vadd.xlane.f32.xlu1 %v1707_v15  ;;  %v1704_v44 = vsel %vm1571_vm1, %v2992_v55, 0.0  ;;  %v3828_v18 = vpop.permute.xlu0 %1822 }
 0x366   : > { %1705 = vadd.xlane.f32.xlu0 %v1704_v44  ;;  %vm1843_vm14 = vcmp.eq.s32.totalorder %v3830_v45, %v3828_v18 }
 0x36b   : > { %v2994_v56 = vpop.eup %2993 }
 0x36c   : > { %v2996_v0 = vpop.eup %2995  ;;  %v1713_v58 = vsel %vm1571_vm1, %v2994_v56, 0.0 }
 0x36d   : > { %1714 = vadd.xlane.f32.xlu1 %v1713_v58  ;;  %v1710_v41 = vsel %vm1571_vm1, %v2996_v0, 0.0 }
 0x36e   : > { %1711 = vadd.xlane.f32.xlu0 %v1710_v41 }
 0x37e   : > { %1825 = vperm.xlu1 %2851, %v1780_v47  }
 0x384   : > { %1828 = vperm.xlu0 %2850, %v1781_v60  }
 0x3c2   : > { %v1673_v5 = vpop.xlane.xlu1 %1672 }
 0x3c3   : > { %2997 = vlog2.f32 %v1673_v5  ;;  %v2362_v5 = vsel %vm1834_vm7, 1.0, %v3196_v36 }
 0x3c6   : > { %v1670_v8 = vpop.xlane.xlu0 %1669 }
 0x3c7   : > { %2999 = vlog2.f32 %v1670_v8 }
 0x3ca   : > { %v1679_v31 = vpop.xlane.xlu1 %1678 }
 0x3cb   : > { %3001 = vlog2.f32 %v1679_v31 }
 0x3cd   : > { %v2998_v49 = vpop.eup %2997 }
 0x3ce   : > { %v1719_v27 = vmul.f32 0.6931472, %v2998_v49  ;;  %v1676_v30 = vpop.xlane.xlu0 %1675 }
 0x3cf   : > { %3003 = vlog2.f32 %v1676_v30 }
 0x3d0   : > { %v1749_v21 = vsub.f32 %v3743_v17, %v1719_v27  ;;  %v2358_v17 = vsel %vm1830_vm3, 1.0, %v3196_v36  ;;  %vm1958_vm3 = vcmask 7168  }
 0x3d1   : > { %v3000_v61 = vpop.eup %2999 }
 0x3d2   : > { %v1717_v22 = vmul.f32 0.6931472, %v3000_v61  ;;  %v1685_v54 = vpop.xlane.xlu1 %1684  ;;  %v1879_v63 = vmul.f32 %v2359_v51, %v1749_v21  ;;  %v2365_v61 = vsel %vm1837_vm8, 1.0, %v3196_v36 }
 0x3d3   : > { %3005 = vlog2.f32 %v1685_v54  ;;  %v1682_v42 = vpop.xlane.xlu0 %1681 }
 0x3d4   : > { %3007 = vlog2.f32 %v1682_v42  ;;  %v1897_v12 = vsel %vm1571_vm1, %v1879_v63, 0.0  ;;  %v1748_v29 = vsub.f32 %v3749_v50, %v1717_v22  ;;  %v2364_v22 = vsel %vm1836_vm9, 1.0, %v3196_v36 }
 0x3d5   : > { %v3002_v43 = vpop.eup %3001  ;;  %1898 = vadd.xlane.f32.xlu0 %v1897_v12 }
 0x3d6   : > { %v1723_v2 = vmul.f32 0.6931472, %v3002_v43  ;;  %v1878_v35 = vmul.f32 %v2358_v17, %v1748_v29 }
 0x3d8   : > { %v1894_v11 = vsel %vm1571_vm1, %v1878_v35, 0.0  ;;  %v1751_v32 = vsub.f32 %v3753_v25, %v1723_v2  ;;  %v2360_v25 = vsel %vm1832_vm5, 1.0, %v3196_v36  ;;  %v2367_v2 = vsel %vm1839_vm10, 1.0, %v3196_v36 }
 0x3d9   : > { %v3004_v57 = vpop.eup %3003  ;;  %1895 = vadd.xlane.f32.xlu1 %v1894_v11  ;;  %v2366_v11 = vsel %vm1838_vm11, 1.0, %v3196_v36 }
 0x3da   : > { %v1721_v50 = vmul.f32 0.6931472, %v3004_v57  ;;  %v1691_v26 = vpop.xlane.xlu1 %1690  ;;  %v1881_v53 = vmul.f32 %v2361_v52, %v1751_v32 }
 0x3db   : > { %3009 = vlog2.f32 %v1691_v26  ;;  %v1688_v55 = vpop.xlane.xlu0 %1687 }
 0x3dc   : > { %3011 = vlog2.f32 %v1688_v55  ;;  %v1903_v10 = vsel %vm1571_vm1, %v1881_v53, 0.0  ;;  %v1750_v15 = vsub.f32 %v3757_v33, %v1721_v50  ;;  %v2363_v33 = vsel %vm1835_vm6, 1.0, %v3196_v36 }
 0x3dd   : > { %v3006_v44 = vpop.eup %3005  ;;  %1904 = vadd.xlane.f32.xlu1 %v1903_v10  ;;  %v2369_v10 = vsel %vm1841_vm12, 1.0, %v3196_v36 }
 0x3de   : > { %v3008_v56 = vpop.eup %3007  ;;  %v1727_v0 = vmul.f32 0.6931472, %v3006_v44  ;;  %v1880_v23 = vmul.f32 %v2360_v25, %v1750_v15  ;;  %v2368_v44 = vsel %vm1840_vm13, 1.0, %v3196_v36 }
 0x3df   : > { %v1725_v58 = vmul.f32 0.6931472, %v3008_v56 }
 0x3e0   : > { %v1900_v41 = vsel %vm1571_vm1, %v1880_v23, 0.0  ;;  %v1753_v47 = vsub.f32 %v3762_v3, %v1727_v0 }
 0x3e1   : > { %1901 = vadd.xlane.f32.xlu0 %v1900_v41  ;;  %v1752_v60 = vsub.f32 %v3765_v39, %v1725_v58 }
 0x3e2   : > { %v1697_v6 = vpop.xlane.xlu1 %1696  ;;  %v1883_v8 = vmul.f32 %v2363_v33, %v1753_v47  ;;  %v2371_v33 = vsel %vm1843_vm14, 1.0, %v3196_v36 }
 0x3e3   : > { %3013 = vlog2.f32 %v1697_v6  ;;  %v1694_v28 = vpop.xlane.xlu0 %1693  ;;  %v1882_v31 = vmul.f32 %v2362_v5, %v1752_v60  ;;  %v2370_v5 = vsel %vm1842_vm15, 1.0, %v3196_v36 }
 0x3e4   : > { %3015 = vlog2.f32 %v1694_v28  ;;  %v1909_v4 = vsel %vm1571_vm1, %v1883_v8, 0.0 }
 0x3e5   : > { %v3010_v49 = vpop.eup %3009  ;;  %1910 = vadd.xlane.f32.xlu1 %v1909_v4  ;;  %v1906_v27 = vsel %vm1571_vm1, %v1882_v31, 0.0 }
 0x3e6   : > { %v3012_v3 = vpop.eup %3011  ;;  %v1731_v30 = vmul.f32 0.6931472, %v3010_v49  ;;  %1907 = vadd.xlane.f32.xlu0 %v1906_v27 }
 0x3e7   : > { %v1729_v39 = vmul.f32 0.6931472, %v3012_v3 }
 0x3e8   : > { %v1755_v21 = vsub.f32 %v3772_v48, %v1731_v30 }
 0x3e9   : > { %v1754_v51 = vsub.f32 %v3775_v40, %v1729_v39 }
 0x3ea   : > { %v1703_v54 = vpop.xlane.xlu1 %1702  ;;  %v1885_v63 = vmul.f32 %v2365_v61, %v1755_v21 }
 0x3eb   : > { %3017 = vlog2.f32 %v1703_v54  ;;  %v1700_v42 = vpop.xlane.xlu0 %1699  ;;  %v1884_v12 = vmul.f32 %v2364_v22, %v1754_v51 }
 0x3ec   : > { %3019 = vlog2.f32 %v1700_v42  ;;  %v1915_v9 = vsel %vm1571_vm1, %v1885_v63, 0.0 }
 0x3ed   : > { %v3014_v29 = vpop.eup %3013  ;;  %1916 = vadd.xlane.f32.xlu1 %v1915_v9  ;;  %v1912_v1 = vsel %vm1571_vm1, %v1884_v12, 0.0 }
 0x3ee   : > { %v3016_v43 = vpop.eup %3015  ;;  %v1735_v48 = vmul.f32 0.6931472, %v3014_v29  ;;  %1913 = vadd.xlane.f32.xlu0 %v1912_v1 }
 0x3ef   : > { %v1733_v40 = vmul.f32 0.6931472, %v3016_v43 }
 0x3f0   : > { %v1757_v17 = vsub.f32 %v3782_v59, %v1735_v48 }
 0x3f1   : > { %v1756_v35 = vsub.f32 %v3786_v62, %v1733_v40 }
 0x3f2   : > { %v1709_v32 = vpop.xlane.xlu1 %1708  ;;  %v1887_v57 = vmul.f32 %v2367_v2, %v1757_v17 }
 0x3f3   : > { %3021 = vlog2.f32 %v1709_v32  ;;  %v1706_v52 = vpop.xlane.xlu0 %1705  ;;  %v1886_v50 = vmul.f32 %v2366_v11, %v1756_v35 }
 0x3f4   : > { %3023 = vlog2.f32 %v1706_v52  ;;  %v1921_v13 = vsel %vm1571_vm1, %v1887_v57, 0.0 }
 0x3f5   : > { %v3018_v26 = vpop.eup %3017  ;;  %1922 = vadd.xlane.f32.xlu1 %v1921_v13  ;;  %v1918_v16 = vsel %vm1571_vm1, %v1886_v50, 0.0 }
 0x3f6   : > { %v3020_v53 = vpop.eup %3019  ;;  %v1739_v59 = vmul.f32 0.6931472, %v3018_v26  ;;  %1919 = vadd.xlane.f32.xlu0 %v1918_v16 }
 0x3f7   : > { %v1737_v62 = vmul.f32 0.6931472, %v3020_v53 }
 0x3f8   : > { %v1759_v55 = vsub.f32 %v3792_v19, %v1739_v59 }
 0x3f9   : > { %v1758_v15 = vsub.f32 %v3796_v24, %v1737_v62 }
 0x3fa   : > { %v1715_v25 = vpop.xlane.xlu1 %1714  ;;  %v1889_v56 = vmul.f32 %v2369_v10, %v1759_v55 }
 0x3fb   : > { %3025 = vlog2.f32 %v1715_v25  ;;  %v1712_v0 = vpop.xlane.xlu0 %1711  ;;  %v1888_v23 = vmul.f32 %v2368_v44, %v1758_v15 }
 0x3fc   : > { %3027 = vlog2.f32 %v1712_v0  ;;  %v1927_v14 = vsel %vm1571_vm1, %v1889_v56, 0.0 }
 0x3fd   : > { %v3022_v58 = vpop.eup %3021  ;;  %1928 = vadd.xlane.f32.xlu1 %v1927_v14  ;;  %v1924_v20 = vsel %vm1571_vm1, %v1888_v23, 0.0 }
 0x3fe   : > { %v3024_v41 = vpop.eup %3023  ;;  %v1743_v19 = vmul.f32 0.6931472, %v3022_v58  ;;  %1925 = vadd.xlane.f32.xlu0 %v1924_v20  ;;  %v1826_v31 = vpop.permute.xlu1 %1825 }
 0x3ff   : > { %v1741_v24 = vmul.f32 0.6931472, %v3024_v41  ;;  %vm1844_vm2 = vcmp.eq.s32.totalorder %v3830_v45, %v1826_v31 }
 0x400   : > { %v1761_v47 = vsub.f32 %v3802_v38, %v1743_v19  ;;  %v2372_v39 = vsel %vm1844_vm2, 1.0, %v3196_v36 }
 0x401   : > { %v1760_v60 = vsub.f32 %v3806_v34, %v1741_v24 }
 0x402   : > { %v1891_v6 = vmul.f32 %v2371_v33, %v1761_v47 }
 0x403   : > { %v1829_v8 = vpop.permute.xlu0 %1828  ;;  %v1890_v28 = vmul.f32 %v2370_v5, %v1760_v60 }
 0x404   : > { %v1933_v18 = vsel %vm1571_vm1, %v1891_v6, 0.0  ;;  %vm1845_vm0 = vcmp.eq.s32.totalorder %v3830_v45, %v1829_v8 }
 0x405   : > { %v3026_v4 = vpop.eup %3025  ;;  %1934 = vadd.xlane.f32.xlu1 %v1933_v18  ;;  %v1930_v49 = vsel %vm1571_vm1, %v1890_v28, 0.0  ;;  %v2373_v3 = vsel %vm1845_vm0, 1.0, %v3196_v36 }
 0x406   : > { %v3028_v7 = vpop.eup %3027  ;;  %v1747_v27 = vmul.f32 0.6931472, %v3026_v4  ;;  %1931 = vadd.xlane.f32.xlu0 %v1930_v49 }
 0x407   : > { %v1745_v38 = vmul.f32 0.6931472, %v3028_v7 }
 0x408   : > { %v1763_v34 = vsub.f32 %v3812_v46, %v1747_v27 }
 0x409   : > { %v1762_v30 = vsub.f32 %v3816_v37, %v1745_v38 }
 0x40a   : > { %v1893_v21 = vmul.f32 %v2373_v3, %v1763_v34 }
 0x40b   : > { %v1892_v61 = vmul.f32 %v2372_v39, %v1762_v30 }
 0x40c   : > { %v1939_v51 = vsel %vm1571_vm1, %v1893_v21, 0.0 }
 0x40d   : > { %1940 = vadd.xlane.f32.xlu1 %v1939_v51  ;;  %v1936_v22 = vsel %vm1571_vm1, %v1892_v61, 0.0 }
 0x40e   : > { %1937 = vadd.xlane.f32.xlu0 %v1936_v22 }
 0x462   : > { %v1899_v54 = vpop.xlane.xlu0 %1898 }
 0x463   : > { %v1943_v45 = vsub.f32 0.0, %v1899_v54 }
 0x465   : > { %1960 = vst.msk [vmem:[%s3911_s12 + $0x8] sm:$0xff] %vm1958_vm3, %v1943_v45 }
 0x466   : > { %v1896_v46 = vpop.xlane.xlu1 %1895 }
 0x467   : > { %v1942_v37 = vsub.f32 0.0, %v1896_v46 }
 0x469   : > { %1959 = vst.msk [vmem:[%s3911_s12] sm:$0xff] %vm1958_vm3, %v1942_v37 }
 0x46a   : > { %v1905_v36 = vpop.xlane.xlu1 %1904 }
 0x46b   : > { %v1945_v63 = vsub.f32 0.0, %v1905_v36 }
 0x46d   : > { %1962 = vst.msk [vmem:[%s3911_s12 + $0x18] sm:$0xff] %vm1958_vm3, %v1945_v63 }
 0x46e   : > { %v1902_v42 = vpop.xlane.xlu0 %1901 }
 0x46f   : > { %v1944_v12 = vsub.f32 0.0, %v1902_v42 }
 0x471   : > { %1961 = vst.msk [vmem:[%s3911_s12 + $0x10] sm:$0xff] %vm1958_vm3, %v1944_v12 }
 0x472   : > { %v1911_v9 = vpop.xlane.xlu1 %1910 }
 0x473   : > { %v1947_v29 = vsub.f32 0.0, %v1911_v9  ;;  %v1908_v1 = vpop.xlane.xlu0 %1907 }
 0x474   : > { %v1946_v43 = vsub.f32 0.0, %v1908_v1 }
 0x475   : > { %1964 = vst.msk [vmem:[%s3911_s12 + $0x28] sm:$0xff] %vm1958_vm3, %v1947_v29 }
 0x476   : > { %1963 = vst.msk [vmem:[%s3911_s12 + $0x20] sm:$0xff] %vm1958_vm3, %v1946_v43 }
 0x47a   : > { %v1917_v48 = vpop.xlane.xlu1 %1916 }
 0x47b   : > { %v1949_v40 = vsub.f32 0.0, %v1917_v48  ;;  %v1914_v17 = vpop.xlane.xlu0 %1913 }
 0x47c   : > { %v1948_v2 = vsub.f32 0.0, %v1914_v17 }
 0x47d   : > { %1966 = vst.msk [vmem:[%s3911_s12 + $0x38] sm:$0xff] %vm1958_vm3, %v1949_v40 }
 0x47e   : > { %1965 = vst.msk [vmem:[%s3911_s12 + $0x30] sm:$0xff] %vm1958_vm3, %v1948_v2 }
 0x482   : > { %v1923_v35 = vpop.xlane.xlu1 %1922 }
 0x483   : > { %v1951_v11 = vsub.f32 0.0, %v1923_v35  ;;  %v1920_v32 = vpop.xlane.xlu0 %1919 }
 0x484   : > { %v1950_v57 = vsub.f32 0.0, %v1920_v32 }
 0x485   : > { %1968 = vst.msk [vmem:[%s3911_s12 + $0x48] sm:$0xff] %vm1958_vm3, %v1951_v11 }
 0x486   : > { %1967 = vst.msk [vmem:[%s3911_s12 + $0x40] sm:$0xff] %vm1958_vm3, %v1950_v57 }
 0x48a   : > { %v1929_v52 = vpop.xlane.xlu1 %1928 }
 0x48b   : > { %v1953_v50 = vsub.f32 0.0, %v1929_v52  ;;  %v1926_v13 = vpop.xlane.xlu0 %1925 }
 0x48c   : > { %v1952_v26 = vsub.f32 0.0, %v1926_v13 }
 0x48d   : > { %1970 = vst.msk [vmem:[%s3911_s12 + $0x58] sm:$0xff] %vm1958_vm3, %v1953_v50 }
 0x48e   : > { %1969 = vst.msk [vmem:[%s3911_s12 + $0x50] sm:$0xff] %vm1958_vm3, %v1952_v26 }
 0x492   : > { %v1935_v16 = vpop.xlane.xlu1 %1934 }
 0x493   : > { %v1955_v53 = vsub.f32 0.0, %v1935_v16  ;;  %v1932_v59 = vpop.xlane.xlu0 %1931 }
 0x494   : > { %v1954_v62 = vsub.f32 0.0, %v1932_v59 }
 0x495   : > { %1972 = vst.msk [vmem:[%s3911_s12 + $0x68] sm:$0xff] %vm1958_vm3, %v1955_v53 }
 0x496   : > { %1971 = vst.msk [vmem:[%s3911_s12 + $0x60] sm:$0xff] %vm1958_vm3, %v1954_v62 }
 0x498   : > { %1981 = sbr.rel (!%p4068_p7) target bundleno = 1232 (0x4d0), region = 56 }
 0x49a   : > { %v1941_v55 = vpop.xlane.xlu1 %1940 }
 0x49b   : > { %v1957_v10 = vsub.f32 0.0, %v1941_v55  ;;  %v1938_v15 = vpop.xlane.xlu0 %1937 }
 0x49c   : > { %v1956_v44 = vsub.f32 0.0, %v1938_v15 }
 0x49d   : > { %1974 = vst.msk [vmem:[%s3911_s12 + $0x78] sm:$0xff] %vm1958_vm3, %v1957_v10 }
 0x49e   : > { %1973 = vst.msk [vmem:[%s3911_s12 + $0x70] sm:$0xff] %vm1958_vm3, %v1956_v44 }
 0x49f   : > { %s4079_s28 = smov (!%p1984_p9, %s1983_s28), 16 }
 0x4a0   : > { %s2376_s10 = sshll.u32 %s4079_s28, 7 }
 0x4a1   : > { %p2379_p12 = scmp.eq.s32.totalorder %s2376_s10, 0 }
 0x4a2   : > { %s3958_s13 = sshrl.u32 (!%p2379_p12), %s4079_s28, 4 }
 0x4a3   : > { %1992 = sbr.rel (%p2379_p12) target bundleno = 1232 (0x4d0), region = 60  ;;  %p2380_p0 = scmp.le.s32.totalorder (!%p2379_p12), %s3958_s13, 0 }
 0x4aa   : > { %2221 = sbr.rel (%p2380_p0) target bundleno = 1211 (0x4bb), region = 145  ;;  %s4069_s25 = smov (!%p2380_p0), %s3952_s21 }
 0x4ab   : > { %s4070_s8 = smov (!%p2380_p0), %s3911_s12  ;;  %s3967_s24 = smov (!%p2380_p0), 0  }
 0x4ac   : > { %s3969_s7 = smov (!%p2380_p0), 0  }
 0x4b1 LB: >> { %v2084_v25 = vld [vmem:[%s3163_s8] sm:$0xff]  ;;  %v2086_v56 = vld [vmem:[%s3163_s8 + $0x8] sm:$0xff]  ;;  %v2088_v0 = vld [vmem:[%s3163_s8 + $0x10] sm:$0xff]  ;;  %s2116_s9 = sadd.s32 1, %s3167_s24  ;;  %s2078_s7 = sadd.s32 1, %s3171_s7   ;;  %s3171_s7 = sphi %s3969_s7, %s2078_s7   ;;  %s3167_s24 = sphi %s3967_s24, %s4071_s24   ;;  %s3163_s8 = sphi %s4070_s8, %s2121_s8   ;;  %s3159_s25 = sphi %s4069_s25, %s2122_s25  }
 0x4b2   : >> { %2085 = vst [vmem:[%s3159_s25] sm:$0xff] %v2084_v25  ;;  %2087 = vst [vmem:[%s3159_s25 + $0x8] sm:$0xff] %v2086_v56  ;;  %v2090_v23 = vld [vmem:[%s3163_s8 + $0x18] sm:$0xff]  ;;  %v2092_v14 = vld [vmem:[%s3163_s8 + $0x20] sm:$0xff]  ;;  %p2117_p2 = scmp.ge.s32.totalorder %s2116_s9, %s3958_s13  ;;  %p2077_p4 = scmp.ge.s32.totalorder %s2078_s7, %s3958_s13 }
 0x4b3   : >> { %2089 = vst [vmem:[%s3159_s25 + $0x10] sm:$0xff] %v2088_v0  ;;  %v2094_v58 = vld [vmem:[%s3163_s8 + $0x28] sm:$0xff]  ;;  %2091 = vst [vmem:[%s3159_s25 + $0x18] sm:$0xff] %v2090_v23  ;;  %v2096_v20 = vld [vmem:[%s3163_s8 + $0x30] sm:$0xff] }
 0x4b4   : >> { %2093 = vst [vmem:[%s3159_s25 + $0x20] sm:$0xff] %v2092_v14  ;;  %2095 = vst [vmem:[%s3159_s25 + $0x28] sm:$0xff] %v2094_v58  ;;  %v2098_v41 = vld [vmem:[%s3163_s8 + $0x38] sm:$0xff]  ;;  %v2100_v19 = vld [vmem:[%s3163_s8 + $0x40] sm:$0xff]  ;;  %s4081_s9 = smov (%p2117_p2, %s2116_s9), 0  ;;  %2080 = sbr.rel (!%p2077_p4) target bundleno = 1201 (0x4b1), region = 151 }
 0x4b5   : >> { %2097 = vst [vmem:[%s3159_s25 + $0x30] sm:$0xff] %v2096_v20  ;;  %2099 = vst [vmem:[%s3159_s25 + $0x38] sm:$0xff] %v2098_v41  ;;  %v2102_v24 = vld [vmem:[%s3163_s8 + $0x48] sm:$0xff]  ;;  %v2104_v47 = vld [vmem:[%s3163_s8 + $0x50] sm:$0xff]  ;;  %s2381_s17 = sshll.u32 %s4081_s9, 7  ;;  %s4071_s24 = smov %s4081_s9 }
 0x4b6   : >> { %2101 = vst [vmem:[%s3159_s25 + $0x40] sm:$0xff] %v2100_v19  ;;  %v2106_v33 = vld [vmem:[%s3163_s8 + $0x58] sm:$0xff]  ;;  %2103 = vst [vmem:[%s3159_s25 + $0x48] sm:$0xff] %v2102_v24  ;;  %v2108_v60 = vld [vmem:[%s3163_s8 + $0x60] sm:$0xff] }
 0x4b7   : >> { %2105 = vst [vmem:[%s3159_s25 + $0x50] sm:$0xff] %v2104_v47  ;;  %2107 = vst [vmem:[%s3159_s25 + $0x58] sm:$0xff] %v2106_v33  ;;  %v2110_v5 = vld [vmem:[%s3163_s8 + $0x68] sm:$0xff]  ;;  %v2112_v6 = vld [vmem:[%s3163_s8 + $0x70] sm:$0xff] }
 0x4b8   : >> { %2109 = vst [vmem:[%s3159_s25 + $0x60] sm:$0xff] %v2108_v60  ;;  %2111 = vst [vmem:[%s3159_s25 + $0x68] sm:$0xff] %v2110_v5  ;;  %v2114_v8 = vld [vmem:[%s3163_s8 + $0x78] sm:$0xff]  ;;  %s2121_s8 = scalar_lea.vmem %s3911_s12, %s2381_s17 [#allocation6]  }
 0x4b9   : >> { %2113 = vst [vmem:[%s3159_s25 + $0x70] sm:$0xff] %v2112_v6  ;;  %2115 = vst [vmem:[%s3159_s25 + $0x78] sm:$0xff] %v2114_v8  ;;  %s2122_s25 = scalar_lea.vmem %s3952_s21, %s2381_s17  }
 0x4bb PF: > { %s4027_s18 = sand.u32 15, %s4079_s28   ;;  %s2392_s19 = sshll.u32 %s3958_s13, 7 }
 0x4bc   : > { %s2127_s27 = scalar_lea.vmem %s3911_s12, %s2392_s19 [#allocation6]   ;;  %s2129_s14 = scalar_lea.vmem %s3952_s21, %s2392_s19  }
 0x4bd   : > { %p2386_p8 = scmp.le.s32.totalorder %s4027_s18, 0 }
 0x4be   : > { %s3173_s15 = smov (!%p2386_p8), %s2129_s14   ;;  %s3177_s16 = smov (!%p2386_p8), %s2127_s27  }
 0x4bf   : > { %2235 = sbr.rel (%p2386_p8) target bundleno = 1232 (0x4d0), region = 156  ;;  %s3181_s11 = smov (!%p2386_p8), 0  }
 0x4c0   : > { %s3185_s30 = smov (!%p2386_p8), 0  }
 0x4c6 LB: >> { %v2139_v28 = vld [vmem:[%s3179_s16] sm:$0xff]  ;;  %s2141_s28 = sadd.s32 1, %s3183_s11  ;;  %s2133_s30 = sadd.s32 1, %s3187_s30   ;;  %s3187_s30 = sphi %s3185_s30, %s2133_s30   ;;  %s3183_s11 = sphi %s3181_s11, %s3182_s11   ;;  %s3179_s16 = sphi %s3177_s16, %s2146_s16   ;;  %s3175_s15 = sphi %s3173_s15, %s2147_s15  }
 0x4c7   : >> { %2140 = vst [vmem:[%s3175_s15] sm:$0xff] %v2139_v28  ;;  %p2142_p10 = scmp.ge.s32.totalorder %s2141_s28, %s4027_s18  ;;  %p2132_p13 = scmp.ge.s32.totalorder %s2133_s30, %s4027_s18 }
 0x4c9   : >> { %s4083_s28 = smov (%p2142_p10, %s2141_s28), 0  ;;  %2135 = sbr.rel (!%p2132_p13) target bundleno = 1222 (0x4c6), region = 162 }
 0x4ca   : >> { %s2387_s12 = sshll.u32 %s4083_s28, 3  ;;  %s3182_s11 = smov %s4083_s28  }
 0x4cb   : >> { %s2146_s16 = scalar_lea.vmem %s2127_s27, %s2387_s12 [#allocation6]   ;;  %s2147_s15 = scalar_lea.vmem %s2129_s14, %s2387_s12  }
 0x4d0 PF: > { %p17_p11 = scmp.ge.s32.totalorder %s3254_s26, 4   ;;  %s4072_s21 = smov %s3147_s22 }
 0x4d1   : > { %s4073_s22 = smov %s3151_s23  ;;  %s4074_s23 = smov %s3264_s29 }
 0x4d2   : > { %s4075_s24 = smov %s3254_s26  ;;  %19 = sbr.rel (!%p17_p11) target bundleno = 4 (0x4), region = 173 }
 0x4d9   :  { %2163 = vsyncpa [#allocation3], 1 }
 0x4da   :  { %2165 = vsyncpa [#allocation3 + $0x1], 1 }
 0x4db   :  { %2166 = vsyncpa [#allocation5], 1 }

</bundles_post_ra>
